<compile_context>
chip_gen: v7x
topology: tpu7x:2x2x1
jax: 0.10.0
libtpu: 0.0.40
codegen_flags: <defaults>
</compile_context>

<pallas_src>
import functools

import jax
import jax.numpy as jnp
from jax.experimental import pallas as pl
from jax.experimental.pallas import tpu as pltpu


def _round_up(x, m):
    return ((x + m - 1) // m) * m


# -----------------------------------------------------------------------------
# Fused per-image forward kernel.
#   xcol_ref : (HW, K1P)    bf16 host im2col of the stem input (+ ones column)
#   w1_ref   : (K1P, CMID)  bf16 folded stem weight (last live row = BN bias)
#   w2_ref   : (3, CP, CP)  bf16 block conv weight, dy-grouped / dx-lane-packed
#   b2_ref   : (1, CP)      f32 folded block BN bias
#   wc_ref   : (CP, CP)     bf16 classifier weight
#   bc_ref   : (1, CP)      f32 classifier bias
#   out_ref  : (1, 8, CP)   f32 logits (row 0 of the 8 is the real output)
#   f1s_ref  : (HW+2B, CP)  f32 VMEM scratch: dx-packed, zero-haloed stem output
# -----------------------------------------------------------------------------
def _make_fused_kernel(HW, W, B, cmid, cp):
    def kernel(xcol_ref, w1_ref, w2_ref, b2_ref, wc_ref, bc_ref,
               out_ref, f1s_ref):
        # ---- stem: one dense bf16 MXU dot (im2col + folded BN done on host) --
        f1 = jnp.maximum(
            jnp.dot(xcol_ref[...], w1_ref[...],
                    preferred_element_type=jnp.float32),
            0.0)                                           # (HW, cmid) f32

        # ---- pack three dx-shifted copies of f1 into lane blocks -------------
        # x-border masks applied once, at store time (dy borders are handled by
        # the zero halo rows of the scratch).
        xpos = jax.lax.broadcasted_iota(jnp.int32, (HW, 1), 0) % W
        f1_l = jnp.where(xpos == W - 1, 0.0, f1)   # read back as tap dx = -1
        f1_r = jnp.where(xpos == 0, 0.0, f1)       # read back as tap dx = +1

        # Zero halos + unused lanes, then lane-offset stores of the three
        # dx-shifted copies (two stores are off by one sublane; reads below are
        # all sublane-aligned).
        f1s_ref[...] = jnp.zeros_like(f1s_ref)
        f1s_ref[B + 1:B + 1 + HW, 0:cmid] = f1_l          # dx = -1
        f1s_ref[B:B + HW, cmid:2 * cmid] = f1             # dx =  0
        f1s_ref[B - 1:B - 1 + HW, 2 * cmid:3 * cmid] = f1_r   # dx = +1

        # ---- block conv: 3 aligned reads + 3 dense bf16 dots (dy=-1,0,+1) ----
        acc = None
        for g in range(3):
            s = B + (g - 1) * W                            # multiple of 8
            part = jnp.dot(f1s_ref[s:s + HW, :].astype(jnp.bfloat16),
                           w2_ref[g], preferred_element_type=jnp.float32)
            acc = part if acc is None else acc + part
        f2 = jnp.maximum(acc + b2_ref[...], 0.0)           # (HW, cp) f32

        # ---- head: global average pool + classifier ---------------------------
        pooled = jnp.sum(f2, axis=0, keepdims=True) * (1.0 / HW)   # (1, cp)
        p8 = jnp.broadcast_to(pooled, (8, cp)).astype(jnp.bfloat16)
        out_ref[0, :, :] = (jnp.dot(p8, wc_ref[...],
                                    preferred_element_type=jnp.float32)
                            + bc_ref[...])

    return kernel


# -----------------------------------------------------------------------------
# Host-side parameter preparation (done once): fold BN into conv weights/bias,
# pack conv2 taps into 128-lane contraction groups, cast matmul weights to bf16.
# -----------------------------------------------------------------------------
def prepare_params(p, eps=1e-5):
    cin = p["w1"].shape[0] // 9
    cmid = p["w1"].shape[1]
    ncls = p["wc"].shape[1]
    k1 = 9 * cin + 1                      # +1: ones column carries the BN bias
    k1p = _round_up(k1, 128)
    cp = _round_up(max(cmid, ncls), 128)

    # Stem: fold BN scale into the weight, BN bias into the "ones" row.
    s1 = p["g1"] / jnp.sqrt(p["v1"] + eps)
    bb1 = p["be1"] + (p["b1"] - p["m1"]) * s1
    w1a = jnp.zeros((k1p, cmid), jnp.float32)
    w1a = w1a.at[:9 * cin, :].set(p["w1"] * s1[None, :]).at[9 * cin, :].set(bb1)

    # Block conv: fold BN, then pack taps dy-grouped / dx-lane-blocked.
    s2 = p["g2"] / jnp.sqrt(p["v2"] + eps)
    bb2 = p["be2"] + (p["b2"] - p["m2"]) * s2
    w2f = (p["w2"] * s2[None, :]).reshape(9, cmid, cmid)   # tap-major
    w2p = jnp.zeros((3, cp, cp), jnp.float32)
    for g in range(3):            # dy3 = 0,1,2  <->  dy = -1,0,+1
        for b in range(3):        # dx3 = 0,1,2  <->  dx = -1,0,+1
            w2p = w2p.at[g, b * cmid:(b + 1) * cmid, :cmid].set(w2f[g * 3 + b])
    b2p = jnp.zeros((1, cp), jnp.float32).at[0, :cmid].set(bb2)

    wcp = jnp.zeros((cp, cp), jnp.float32).at[:cmid, :ncls].set(p["wc"])
    bcp = jnp.zeros((1, cp), jnp.float32).at[0, :ncls].set(p["bc"][0])

    return {"w1a": w1a.astype(jnp.bfloat16),
            "w2p": w2p.astype(jnp.bfloat16),
            "b2p": b2p,
            "wcp": wcp.astype(jnp.bfloat16),
            "bcp": bcp}


# -----------------------------------------------------------------------------
# Forward pass: host im2col for the tiny stem, then one fused pallas_call with
# a batch-parallel grid.
# -----------------------------------------------------------------------------
@functools.partial(jax.jit, static_argnames=("num_classes",))
def timm_model_forward(x_nchw, prepared, *, num_classes):
    """x_nchw: (N, Cin, H, W) float32 -> logits (N, num_classes)."""
    N, Cin, H, W = x_nchw.shape
    HW = H * W
    cmid = prepared["w1a"].shape[1]
    k1p = prepared["w1a"].shape[0]
    cp = prepared["w2p"].shape[1]
    B = _round_up(W + 1, 8)            # halo rows; multiple of 8 -> aligned reads

    # Host im2col of the stem input (Cin=4 -> only 37 live K lanes); a trailing
    # ones-column carries the folded BN bias so the kernel's stem is one dot.
    x_nhwc = jnp.transpose(x_nchw, (0, 2, 3, 1))
    xpad = jnp.pad(x_nhwc, ((0, 0), (1, 1), (1, 1), (0, 0)))
    cols = [xpad[:, dy:dy + H, dx:dx + W, :]
            for dy in range(3) for dx in range(3)]
    xcol = jnp.concatenate(cols, axis=-1).reshape(N * HW, 9 * Cin)
    xcol = jnp.concatenate([xcol, jnp.ones((N * HW, 1), xcol.dtype)], axis=-1)
    xcol = jnp.pad(xcol, ((0, 0), (0, k1p - (9 * Cin + 1)))).astype(jnp.bfloat16)

    kernel = _make_fused_kernel(HW, W, B, cmid, cp)

    out = pl.pallas_call(
        kernel,
        out_shape=jax.ShapeDtypeStruct((N, 8, cp), jnp.float32),
        grid_spec=pltpu.PrefetchScalarGridSpec(
            num_scalar_prefetch=0,
            grid=(N,),                                     # one image per step
            in_specs=[
                pl.BlockSpec((HW, k1p), lambda n: (n, 0)),
                pl.BlockSpec(prepared["w1a"].shape, lambda n: (0, 0)),
                pl.BlockSpec(prepared["w2p"].shape, lambda n: (0, 0, 0)),
                pl.BlockSpec(prepared["b2p"].shape, lambda n: (0, 0)),
                pl.BlockSpec(prepared["wcp"].shape, lambda n: (0, 0)),
                pl.BlockSpec(prepared["bcp"].shape, lambda n: (0, 0)),
            ],
            out_specs=pl.BlockSpec((1, 8, cp), lambda n: (n, 0, 0)),
            scratch_shapes=[pltpu.VMEM((HW + 2 * B, cp), jnp.float32)],
        ),
        compiler_params=pltpu.CompilerParams(
            dimension_semantics=("parallel",)),            # 2 TCs on v7x
    )(xcol, prepared["w1a"], prepared["w2p"], prepared["b2p"],
      prepared["wcp"], prepared["bcp"])

    return out[:, 0, :num_classes]


# -----------------------------------------------------------------------------
# Plain-JAX f32 reference (same math, im2col formulation) for a self-check.
# -----------------------------------------------------------------------------
def _reference_forward(x_nchw, p, eps=1e-5):
    N, Cin, H, W = x_nchw.shape

    def im2col(x_nhwc):
        xp_ = jnp.pad(x_nhwc, ((0, 0), (1, 1), (1, 1), (0, 0)))
        pats = [xp_[:, dy:dy + H, dx:dx + W, :]
                for dy in range(3) for dx in range(3)]
        return jnp.concatenate(pats, axis=-1).reshape(N * H * W, -1)

    def fold(g, be, m, v, b):
        s = g / jnp.sqrt(v + eps)
        return s, be + (b - m) * s

    x = jnp.transpose(x_nchw, (0, 2, 3, 1))
    s1, bb1 = fold(p["g1"], p["be1"], p["m1"], p["v1"], p["b1"])
    f1 = jnp.maximum(im2col(x) @ p["w1"] * s1 + bb1, 0.0).reshape(N, H, W, -1)
    s2, bb2 = fold(p["g2"], p["be2"], p["m2"], p["v2"], p["b2"])
    f2 = jnp.maximum(im2col(f1) @ p["w2"] * s2 + bb2, 0.0).reshape(N, H * W, -1)
    pooled = f2.mean(axis=1)
    return pooled @ p["wc"] + p["bc"]


# -----------------------------------------------------------------------------
# Deterministic synthetic params.
# -----------------------------------------------------------------------------
def init_params(key, cin=4, cmid=32, num_classes=10):
    ks = jax.random.split(key, 12)
    p = {}
    p["w1"] = jax.random.normal(ks[0], (9 * cin, cmid), jnp.float32) * 0.1
    p["b1"] = jax.random.normal(ks[1], (cmid,), jnp.float32) * 0.01
    p["g1"] = 1.0 + 0.1 * jax.random.normal(ks[2], (cmid,), jnp.float32)
    p["be1"] = 0.1 * jax.random.normal(ks[3], (cmid,), jnp.float32)
    p["m1"] = 0.1 * jax.random.normal(ks[4], (cmid,), jnp.float32)
    p["v1"] = jnp.abs(1.0 + 0.1 * jax.random.normal(ks[5], (cmid,), jnp.float32))

    p["w2"] = jax.random.normal(ks[6], (9 * cmid, cmid), jnp.float32) * 0.05
    p["b2"] = jax.random.normal(ks[7], (cmid,), jnp.float32) * 0.01
    p["g2"] = 1.0 + 0.1 * jax.random.normal(ks[8], (cmid,), jnp.float32)
    p["be2"] = 0.1 * jax.random.normal(ks[9], (cmid,), jnp.float32)
    p["m2"] = 0.1 * jax.random.normal(ks[10], (cmid,), jnp.float32)
    p["v2"] = jnp.abs(1.0 + 0.1 * jax.random.normal(ks[11], (cmid,), jnp.float32))

    kh = jax.random.split(ks[0], 2)
    p["wc"] = jax.random.normal(kh[0], (cmid, num_classes), jnp.float32) * 0.1
    p["bc"] = jax.random.normal(kh[1], (1, num_classes), jnp.float32) * 0.01
    return p


if __name__ == "__main__":
    key = jax.random.PRNGKey(0)
    k_x, k_p = jax.random.split(key)

    # Input matching PyTorch NCHW convention: batch=2, channels=4, 16x16.
    x = jax.random.normal(k_x, (2, 4, 16, 16), jnp.float32)
    params = init_params(k_p, cin=4, cmid=32, num_classes=10)
    prepared = prepare_params(params)

    out = timm_model_forward(x, prepared, num_classes=10)
    jax.block_until_ready(out)

    assert out.shape == (2, 10), out.shape
    assert jnp.all(jnp.isfinite(out))

    ref = _reference_forward(x, params)
    max_err = float(jnp.max(jnp.abs(out - ref)))
    # bf16 matmul inputs with f32 accumulation vs. an f32 reference.
    assert jnp.allclose(out, ref, atol=3e-2, rtol=3e-2), max_err

    print("KERNEL_OK")
</pallas_src>

<mosaic_0001>
module attributes {stable_mosaic.version = 11 : i64} {
  func.func @kernel(%arg0: i32, %arg1: memref<256x128xbf16, #tpu.memory_space<vmem>>, %arg2: memref<128x32xbf16, #tpu.memory_space<vmem>>, %arg3: memref<3x128x128xbf16, #tpu.memory_space<vmem>>, %arg4: memref<1x128xf32, #tpu.memory_space<vmem>>, %arg5: memref<128x128xbf16, #tpu.memory_space<vmem>>, %arg6: memref<1x128xf32, #tpu.memory_space<vmem>>, %arg7: memref<1x8x128xf32, #tpu.memory_space<vmem>>, %arg8: memref<304x128xf32, #tpu.memory_space<vmem>>) attributes {dimension_semantics = [#tpu.dimension_semantics<parallel>], iteration_bounds = array<i64: 2>, scalar_prefetch = 0 : i64, scratch_operands = 1 : i64, tpu.core_type = #tpu.core_type<tc>, window_params = [{transform_indices = @transform_0, window_bounds = array<i64: 256, 128>}, {pipeline_mode = #tpu.pipeline_mode<synchronous>, transform_indices = @transform_1, window_bounds = array<i64: 128, 32>}, {pipeline_mode = #tpu.pipeline_mode<synchronous>, transform_indices = @transform_2, window_bounds = array<i64: 3, 128, 128>}, {pipeline_mode = #tpu.pipeline_mode<synchronous>, transform_indices = @transform_3, window_bounds = array<i64: 1, 128>}, {pipeline_mode = #tpu.pipeline_mode<synchronous>, transform_indices = @transform_4, window_bounds = array<i64: 128, 128>}, {pipeline_mode = #tpu.pipeline_mode<synchronous>, transform_indices = @transform_5, window_bounds = array<i64: 1, 128>}, {transform_indices = @transform_6, window_bounds = array<i64: 1, 8, 128>}]} {
    %c0 = arith.constant 0 : index
    %c0_0 = arith.constant 0 : index
    %0 = vector.load %arg1[%c0, %c0_0] : memref<256x128xbf16, #tpu.memory_space<vmem>>, vector<256x128xbf16>
    %c0_1 = arith.constant 0 : index
    %c0_2 = arith.constant 0 : index
    %1 = vector.load %arg2[%c0_1, %c0_2] : memref<128x32xbf16, #tpu.memory_space<vmem>>, vector<128x32xbf16>
    %cst = arith.constant dense<0.000000e+00> : vector<256x32xf32>
    %2 = tpu.matmul %0, %1, %cst {dimension_numbers = #tpu.dot_dimension_numbers<[1], [0], [0], [1], [0, 0, 1, 1], [], []>} : vector<256x128xbf16>, vector<128x32xbf16>, vector<256x32xf32> -> vector<256x32xf32>
    %cst_3 = arith.constant 0.000000e+00 : f32
    %3 = vector.broadcast %cst_3 : f32 to vector<256x32xf32>
    %4 = arith.maximumf %2, %3 : vector<256x32xf32>
    %5 = tpu.iota {dimensions = array<i32: 0>} : vector<256x1xi32>
    %c16_i32 = arith.constant 16 : i32
    %c0_i32 = arith.constant 0 : i32
    %6 = arith.cmpi eq, %c16_i32, %c0_i32 : i32
    %c1_i32 = arith.constant 1 : i32
    %7 = arith.select %6, %c1_i32, %c16_i32 : i32
    %8 = vector.broadcast %7 : i32 to vector<256x1xi32>
    %9 = arith.remsi %5, %8 : vector<256x1xi32>
    %c0_i32_4 = arith.constant 0 : i32
    %10 = vector.broadcast %c0_i32_4 : i32 to vector<256x1xi32>
    %11 = arith.cmpi ne, %9, %10 : vector<256x1xi32>
    %c0_i32_5 = arith.constant 0 : i32
    %12 = vector.broadcast %c0_i32_5 : i32 to vector<256x1xi32>
    %13 = arith.cmpi slt, %9, %12 : vector<256x1xi32>
    %c0_i32_6 = arith.constant 0 : i32
    %14 = arith.cmpi slt, %7, %c0_i32_6 : i32
    %15 = vector.broadcast %14 : i1 to vector<256x1xi1>
    %16 = vector.broadcast %15 : vector<256x1xi1> to vector<256x1xi1>
    %17 = arith.xori %13, %16 : vector<256x1xi1>
    %18 = arith.andi %17, %11 : vector<256x1xi1>
    %19 = vector.broadcast %7 : i32 to vector<256x1xi32>
    %20 = arith.addi %9, %19 : vector<256x1xi32>
    %21 = arith.select %18, %20, %9 : vector<256x1xi1>, vector<256x1xi32>
    %c15_i32 = arith.constant 15 : i32
    %22 = vector.broadcast %c15_i32 : i32 to vector<256x1xi32>
    %23 = arith.cmpi eq, %21, %22 : vector<256x1xi32>
    %cst_7 = arith.constant 0.000000e+00 : f32
    %24 = vector.shape_cast %23 : vector<256x1xi1> to vector<256x1xi1>
    %25 = vector.broadcast %24 : vector<256x1xi1> to vector<256x32xi1>
    %26 = vector.broadcast %cst_7 : f32 to vector<256x32xf32>
    %27 = arith.select %25, %26, %4 : vector<256x32xi1>, vector<256x32xf32>
    %c0_i32_8 = arith.constant 0 : i32
    %28 = vector.broadcast %c0_i32_8 : i32 to vector<256x1xi32>
    %29 = arith.cmpi eq, %21, %28 : vector<256x1xi32>
    %cst_9 = arith.constant 0.000000e+00 : f32
    %30 = vector.shape_cast %29 : vector<256x1xi1> to vector<256x1xi1>
    %31 = vector.broadcast %30 : vector<256x1xi1> to vector<256x32xi1>
    %32 = vector.broadcast %cst_9 : f32 to vector<256x32xf32>
    %33 = arith.select %31, %32, %4 : vector<256x32xi1>, vector<256x32xf32>
    %cst_10 = arith.constant 0.000000e+00 : f32
    %34 = vector.broadcast %cst_10 : f32 to vector<304x128xf32>
    %c0_11 = arith.constant 0 : index
    %c0_12 = arith.constant 0 : index
    %35 = vector.load %arg8[%c0_11, %c0_12] : memref<304x128xf32, #tpu.memory_space<vmem>>, vector<304x128xf32>
    tpu.vector_store %arg8[%c0_11, %c0_12], %34 {strides = array<i32>} : memref<304x128xf32, #tpu.memory_space<vmem>>, vector<304x128xf32>,
    %c25 = arith.constant 25 : index
    %c0_13 = arith.constant 0 : index
    %36 = vector.load %arg8[%c25, %c0_13] : memref<304x128xf32, #tpu.memory_space<vmem>>, vector<256x32xf32>
    tpu.vector_store %arg8[%c25, %c0_13], %27 {strides = array<i32>} : memref<304x128xf32, #tpu.memory_space<vmem>>, vector<256x32xf32>,
    %c24 = arith.constant 24 : index
    %c32 = arith.constant 32 : index
    %37 = vector.load %arg8[%c24, %c32] : memref<304x128xf32, #tpu.memory_space<vmem>>, vector<256x32xf32>
    tpu.vector_store %arg8[%c24, %c32], %4 {strides = array<i32>} : memref<304x128xf32, #tpu.memory_space<vmem>>, vector<256x32xf32>,
    %c23 = arith.constant 23 : index
    %c64 = arith.constant 64 : index
    %38 = vector.load %arg8[%c23, %c64] : memref<304x128xf32, #tpu.memory_space<vmem>>, vector<256x32xf32>
    tpu.vector_store %arg8[%c23, %c64], %33 {strides = array<i32>} : memref<304x128xf32, #tpu.memory_space<vmem>>, vector<256x32xf32>,
    %c8 = arith.constant 8 : index
    %c0_14 = arith.constant 0 : index
    %39 = vector.load %arg8[%c8, %c0_14] : memref<304x128xf32, #tpu.memory_space<vmem>>, vector<256x128xf32>
    %40 = arith.truncf %39 : vector<256x128xf32> to vector<256x128xbf16>
    %c0_15 = arith.constant 0 : index
    %c0_16 = arith.constant 0 : index
    %c0_17 = arith.constant 0 : index
    %41 = vector.load %arg3[%c0_15, %c0_16, %c0_17] : memref<3x128x128xbf16, #tpu.memory_space<vmem>>, vector<1x128x128xbf16>
    %42 = vector.shape_cast %41 : vector<1x128x128xbf16> to vector<128x128xbf16>
    %cst_18 = arith.constant dense<0.000000e+00> : vector<256x128xf32>
    %43 = tpu.matmul %40, %42, %cst_18 {dimension_numbers = #tpu.dot_dimension_numbers<[1], [0], [0], [1], [0, 0, 1, 1], [], []>} : vector<256x128xbf16>, vector<128x128xbf16>, vector<256x128xf32> -> vector<256x128xf32>
    %c24_19 = arith.constant 24 : index
    %c0_20 = arith.constant 0 : index
    %44 = vector.load %arg8[%c24_19, %c0_20] : memref<304x128xf32, #tpu.memory_space<vmem>>, vector<256x128xf32>
    %45 = arith.truncf %44 : vector<256x128xf32> to vector<256x128xbf16>
    %c1 = arith.constant 1 : index
    %c0_21 = arith.constant 0 : index
    %c0_22 = arith.constant 0 : index
    %46 = vector.load %arg3[%c1, %c0_21, %c0_22] : memref<3x128x128xbf16, #tpu.memory_space<vmem>>, vector<1x128x128xbf16>
    %47 = vector.shape_cast %46 : vector<1x128x128xbf16> to vector<128x128xbf16>
    %cst_23 = arith.constant dense<0.000000e+00> : vector<256x128xf32>
    %48 = tpu.matmul %45, %47, %cst_23 {dimension_numbers = #tpu.dot_dimension_numbers<[1], [0], [0], [1], [0, 0, 1, 1], [], []>} : vector<256x128xbf16>, vector<128x128xbf16>, vector<256x128xf32> -> vector<256x128xf32>
    %49 = arith.addf %43, %48 : vector<256x128xf32>
    %c40 = arith.constant 40 : index
    %c0_24 = arith.constant 0 : index
    %50 = vector.load %arg8[%c40, %c0_24] : memref<304x128xf32, #tpu.memory_space<vmem>>, vector<256x128xf32>
    %51 = arith.truncf %50 : vector<256x128xf32> to vector<256x128xbf16>
    %c2 = arith.constant 2 : index
    %c0_25 = arith.constant 0 : index
    %c0_26 = arith.constant 0 : index
    %52 = vector.load %arg3[%c2, %c0_25, %c0_26] : memref<3x128x128xbf16, #tpu.memory_space<vmem>>, vector<1x128x128xbf16>
    %53 = vector.shape_cast %52 : vector<1x128x128xbf16> to vector<128x128xbf16>
    %cst_27 = arith.constant dense<0.000000e+00> : vector<256x128xf32>
    %54 = tpu.matmul %51, %53, %cst_27 {dimension_numbers = #tpu.dot_dimension_numbers<[1], [0], [0], [1], [0, 0, 1, 1], [], []>} : vector<256x128xbf16>, vector<128x128xbf16>, vector<256x128xf32> -> vector<256x128xf32>
    %55 = arith.addf %49, %54 : vector<256x128xf32>
    %c0_28 = arith.constant 0 : index
    %c0_29 = arith.constant 0 : index
    %56 = vector.load %arg4[%c0_28, %c0_29] : memref<1x128xf32, #tpu.memory_space<vmem>>, vector<1x128xf32>
    %57 = vector.broadcast %56 : vector<1x128xf32> to vector<256x128xf32>
    %58 = arith.addf %55, %57 : vector<256x128xf32>
    %cst_30 = arith.constant 0.000000e+00 : f32
    %59 = vector.broadcast %cst_30 : f32 to vector<256x128xf32>
    %60 = arith.maximumf %58, %59 : vector<256x128xf32>
    %cst_31 = arith.constant dense<0.000000e+00> : vector<128xf32>
    %61 = vector.multi_reduction <add>, %60, %cst_31 [0] : vector<256x128xf32> to vector<128xf32>
    %62 = vector.shape_cast %61 : vector<128xf32> to vector<1x128xf32>
    %cst_32 = arith.constant 3.906250e-03 : f32
    %63 = vector.broadcast %cst_32 : f32 to vector<1x128xf32>
    %64 = arith.mulf %62, %63 : vector<1x128xf32>
    %65 = vector.shape_cast %64 : vector<1x128xf32> to vector<1x128xf32>
    %66 = vector.broadcast %65 : vector<1x128xf32> to vector<8x128xf32>
    %67 = arith.truncf %66 : vector<8x128xf32> to vector<8x128xbf16>
    %c0_33 = arith.constant 0 : index
    %c0_34 = arith.constant 0 : index
    %68 = vector.load %arg5[%c0_33, %c0_34] : memref<128x128xbf16, #tpu.memory_space<vmem>>, vector<128x128xbf16>
    %cst_35 = arith.constant dense<0.000000e+00> : vector<8x128xf32>
    %69 = tpu.matmul %67, %68, %cst_35 {dimension_numbers = #tpu.dot_dimension_numbers<[1], [0], [0], [1], [0, 0, 1, 1], [], []>} : vector<8x128xbf16>, vector<128x128xbf16>, vector<8x128xf32> -> vector<8x128xf32>
    %c0_36 = arith.constant 0 : index
    %c0_37 = arith.constant 0 : index
    %70 = vector.load %arg6[%c0_36, %c0_37] : memref<1x128xf32, #tpu.memory_space<vmem>>, vector<1x128xf32>
    %71 = vector.broadcast %70 : vector<1x128xf32> to vector<8x128xf32>
    %72 = arith.addf %69, %71 : vector<8x128xf32>
    %c0_38 = arith.constant 0 : index
    %c0_39 = arith.constant 0 : index
    %c0_40 = arith.constant 0 : index
    %73 = vector.load %arg7[%c0_38, %c0_39, %c0_40] : memref<1x8x128xf32, #tpu.memory_space<vmem>>, vector<1x8x128xf32>
    %74 = vector.shape_cast %73 : vector<1x8x128xf32> to vector<8x128xf32>
    %75 = vector.shape_cast %72 : vector<8x128xf32> to vector<1x8x128xf32>
    tpu.vector_store %arg7[%c0_38, %c0_39, %c0_40], %75 {strides = array<i32>} : memref<1x8x128xf32, #tpu.memory_space<vmem>>, vector<1x8x128xf32>,
    return
  }
  func.func @transform_0(%arg0: i32) -> (i32, i32) {
    %c0_i32 = arith.constant 0 : i32
    %c0_i32_0 = arith.constant 0 : i32
    return %arg0, %c0_i32 : i32, i32
  }
  func.func @transform_1(%arg0: i32) -> (i32, i32) {
    %c0_i32 = arith.constant 0 : i32
    %c0_i32_0 = arith.constant 0 : i32
    %c0_i32_1 = arith.constant 0 : i32
    return %c0_i32, %c0_i32_0 : i32, i32
  }
  func.func @transform_2(%arg0: i32) -> (i32, i32, i32) {
    %c0_i32 = arith.constant 0 : i32
    %c0_i32_0 = arith.constant 0 : i32
    %c0_i32_1 = arith.constant 0 : i32
    %c0_i32_2 = arith.constant 0 : i32
    return %c0_i32, %c0_i32_0, %c0_i32_1 : i32, i32, i32
  }
  func.func @transform_3(%arg0: i32) -> (i32, i32) {
    %c0_i32 = arith.constant 0 : i32
    %c0_i32_0 = arith.constant 0 : i32
    %c0_i32_1 = arith.constant 0 : i32
    return %c0_i32, %c0_i32_0 : i32, i32
  }
  func.func @transform_4(%arg0: i32) -> (i32, i32) {
    %c0_i32 = arith.constant 0 : i32
    %c0_i32_0 = arith.constant 0 : i32
    %c0_i32_1 = arith.constant 0 : i32
    return %c0_i32, %c0_i32_0 : i32, i32
  }
  func.func @transform_5(%arg0: i32) -> (i32, i32) {
    %c0_i32 = arith.constant 0 : i32
    %c0_i32_0 = arith.constant 0 : i32
    %c0_i32_1 = arith.constant 0 : i32
    return %c0_i32, %c0_i32_0 : i32, i32
  }
  func.func @transform_6(%arg0: i32) -> (i32, i32, i32) {
    %c0_i32 = arith.constant 0 : i32
    %c0_i32_0 = arith.constant 0 : i32
    %c0_i32_1 = arith.constant 0 : i32
    return %arg0, %c0_i32, %c0_i32_0 : i32, i32, i32
  }
}

</mosaic_0001>

<bundles_post_ra>
// kernel: timm_model_forward.1
= control target key start
LH: loop header
LB: loop body
LE: loop exit
PB: predicated region body
PF: predicated region fallthrough
CT: control target
= control target key end

     0   :  { %s3384_s21 = smov 0   ;;  %s4174_s0 = inlined_call_operand.vmem [shape: bf16[512,128], index: 0, kind: input, shape index: {}]   ;;  %s4175_s1 = inlined_call_operand.vmem [shape: bf16[128,32], index: 1, kind: input, shape index: {}]   ;;  %s4176_s2 = inlined_call_operand.vmem [shape: bf16[3,128,128], index: 2, kind: input, shape index: {}]   ;;  %s4177_s3 = inlined_call_operand.vmem [shape: f32[1,128], index: 3, kind: input, shape index: {}]   ;;  %s4178_s4 = inlined_call_operand.vmem [shape: bf16[128,128], index: 4, kind: input, shape index: {}]   ;;  %s4179_s5 = inlined_call_operand.vmem [shape: f32[1,128], index: 5, kind: input, shape index: {}]   ;;  %s4180_s6 = inlined_call_operand.vmem [shape: f32[2,8,128], index: 6, kind: output, shape index: {}]  }
   0x1 LB: > { %s3390_s22 = sadd.s32 4294967295, %s3343_s21   ;;  %p2791_p0 = scmp.ge.s32.totalorder %s3343_s21, 1  ;;  %s3343_s21 = sphi %s3384_s21, %s16_s21  }
   0x2   : > { %p213_p1 = scmp.lt.s32.totalorder %s3343_s21, 3 }
   0x4   : > { %p214_p2 = pnand %p2791_p0, %p213_p1 }
   0x5   : > { %v3280_v0 = vld [vmem:[%s4175_s1] sm:$0xff] (!%p214_p2)   ;;  %s2792_s25 = sshll.u32 (!%p214_p2), %s3390_s22, 5  ;;  %v3281_v1 = vld [vmem:[%s4175_s1 + $0x8] sm:$0xff] (!%p214_p2)   ;;  %v3282_v2 = vld [vmem:[%s4175_s1 + $0x10] sm:$0xff] (!%p214_p2)   ;;  %v3345_v24 = vmov (!%p214_p2), 0.0   ;;  %v638_v26 = vlaneseq (!%p214_p2)  ;;  %vm1349_vm0 = vcmask (!%p214_p2), 261120  }
   0x6   : > { %217 = sbr.rel (%p214_p2) target bundleno = 1020 (0x3fc), region = 44  ;;  %p243_p3 = scmp.lt.s32.totalorder (!%p214_p2), %s2792_s25, 63  ;;  %2992 = vmatprep.subr.bf16.mxu0 (!%p214_p2), %v3280_v0  ;;  %v3283_v3 = vld [vmem:[%s4175_s1 + $0x18] sm:$0xff] (!%p214_p2)   ;;  %v3284_v5 = vld [vmem:[%s4175_s1 + $0x20] sm:$0xff] (!%p214_p2)   ;;  %v3285_v6 = vld [vmem:[%s4175_s1 + $0x28] sm:$0xff] (!%p214_p2)   ;;  %1315 = vst [vmem:[#allocation2 + $0x20] sm:$0xff] (!%p214_p2), %v3345_v24 }
   0x7   : > { %2993 = vmatpush3.bf16.msra.mxu0 (!%p214_p2), %v3280_v0  ;;  %v3286_v7 = vld [vmem:[%s4175_s1 + $0x30] sm:$0xff] (!%p214_p2)   ;;  %v3287_v8 = vld [vmem:[%s4175_s1 + $0x38] sm:$0xff] (!%p214_p2)   ;;  %1316 = vst [vmem:[#allocation2 + $0x28] sm:$0xff] (!%p214_p2), %v3345_v24  ;;  %1317 = vst [vmem:[#allocation2 + $0x30] sm:$0xff] (!%p214_p2), %v3345_v24  ;;  %v3484_v29 = vshrl.u32 (!%p214_p2), %v638_v26, 7  ;;  %s3346_s16 = smov (!%p214_p2), 32  }
   0x8   : > { %2994 = vmatprep.subr.bf16.mxu0 (!%p214_p2), %v3281_v1  ;;  %1311 = vst [vmem:[#allocation2] sm:$0xff] (!%p214_p2), %v3345_v24  ;;  %1313 = vst [vmem:[#allocation2 + $0x10] sm:$0xff] (!%p214_p2), %v3345_v24  ;;  %v3304_v25 = vld [vmem:[%s4176_s2] sm:$0xff] (!%p214_p2)   ;;  %v3305_v27 = vld [vmem:[%s4176_s2 + $0x8] sm:$0xff] (!%p214_p2)   ;;  %s3347_s23 = smov (!%p214_p2), 64   ;;  %p248_p4 = scmp.lt.s32.totalorder (!%p214_p2), %s3390_s22, 1 }
   0x9   : > { %1314 = vst [vmem:[#allocation2 + $0x18] sm:$0xff] (!%p214_p2), %v3345_v24  ;;  %1318 = vst [vmem:[#allocation2 + $0x38] sm:$0xff] (!%p214_p2), %v3345_v24  ;;  %3088 = vmatprep.subr.bf16.mxu1 (!%p214_p2), %v3304_v25  ;;  %v3306_v28 = vld [vmem:[%s4176_s2 + $0x40] sm:$0xff] (!%p214_p2)   ;;  %v3307_v30 = vld [vmem:[%s4176_s2 + $0x10] sm:$0xff] (!%p214_p2)   ;;  %v642_v31 = vadd.s32 (!%p214_p2), 24, %v3484_v29  ;;  %v640_v33 = vadd.s32 (!%p214_p2), 8, %v3484_v29 }
   0xa   : > { %1319 = vst [vmem:[#allocation2 + $0x40] sm:$0xff] (!%p214_p2), %v3345_v24  ;;  %1320 = vst [vmem:[#allocation2 + $0x48] sm:$0xff] (!%p214_p2), %v3345_v24  ;;  %3089 = vmatpush3.bf16.msra.mxu1 (!%p214_p2), %v3304_v25  ;;  %v3308_v32 = vld [vmem:[%s4176_s2 + $0x48] sm:$0xff] (!%p214_p2)   ;;  %v641_v34 = vadd.s32 (!%p214_p2), 16, %v3484_v29  ;;  %v3309_v35 = vld [vmem:[%s4176_s2 + $0x18] sm:$0xff] (!%p214_p2)   ;;  %v675_v47 = vand.u32 (!%p214_p2), 15, %v3484_v29 }
   0xb   : > { %2995 = vmatpush3.bf16.msra.mxu0 (!%p214_p2), %v3281_v1  ;;  %1321 = vst [vmem:[#allocation2 + $0x50] sm:$0xff] (!%p214_p2), %v3345_v24  ;;  %1322 = vst [vmem:[#allocation2 + $0x58] sm:$0xff] (!%p214_p2), %v3345_v24  ;;  %3090 = vmatprep.subr.bf16.mxu1 (!%p214_p2), %v3305_v27  ;;  %v696_v36 = vand.u32 (!%p214_p2), 15, %v642_v31  ;;  %v3310_v37 = vld [vmem:[%s4176_s2 + $0x50] sm:$0xff] (!%p214_p2)   ;;  %v682_v38 = vand.u32 (!%p214_p2), 15, %v640_v33  ;;  %v3311_v40 = vld [vmem:[%s4176_s2 + $0x20] sm:$0xff] (!%p214_p2)  }
   0xc   : > { %2996 = vmatprep.subr.bf16.mxu0 (!%p214_p2), %v3282_v2  ;;  %1323 = vst [vmem:[#allocation2 + $0x60] sm:$0xff] (!%p214_p2), %v3345_v24  ;;  %1324 = vst [vmem:[#allocation2 + $0x68] sm:$0xff] (!%p214_p2), %v3345_v24  ;;  %v689_v39 = vand.u32 (!%p214_p2), 15, %v641_v34  ;;  %v646_v48 = vadd.s32 (!%p214_p2), 56, %v3484_v29  ;;  %v3312_v49 = vld [vmem:[%s4176_s2 + $0x58] sm:$0xff] (!%p214_p2)   ;;  %v644_v54 = vadd.s32 (!%p214_p2), 40, %v3484_v29 }
   0xd   : > { %s4208_s25 = smov (!%p243_p3, %s2792_s25), 63  ;;  %1325 = vst [vmem:[#allocation2 + $0x70] sm:$0xff] %v3345_v24  ;;  %1326 = vst [vmem:[#allocation2 + $0x78] sm:$0xff] %v3345_v24  ;;  %vm3504_vm1 = vcmp.eq.s32.totalorder %v696_v36, 15  ;;  %vm3514_vm2 = vcmp.eq.s32.totalorder %v682_v38, 15  ;;  %v3313_v55 = vld [vmem:[%s4176_s2 + $0x28] sm:$0xff]  }
   0xe   : > { %s2793_s30 = sshll.u32 %s4208_s25, 2  ;;  %1327 = vst [vmem:[#allocation2 + $0x80] sm:$0xff] %v3345_v24  ;;  %1328 = vst [vmem:[#allocation2 + $0x88] sm:$0xff] %v3345_v24  ;;  %3091 = vmatpush3.bf16.msra.mxu1 %v3305_v27  ;;  %vm3518_vm3 = vcmp.eq.s32.totalorder %v689_v39, 0  ;;  %v724_v60 = vand.u32 15, %v646_v48  ;;  %v3314_v61 = vld [vmem:[%s4176_s2 + $0x60] sm:$0xff]  }
   0xf   : > { %s3407_s9 = scalar_lea.vmem %s4174_s0, %s2793_s30  ;;  %2997 = vmatpush3.bf16.msra.mxu0 %v3282_v2  ;;  %1329 = vst [vmem:[#allocation2 + $0x90] sm:$0xff] %v3345_v24  ;;  %1330 = vst [vmem:[#allocation2 + $0x98] sm:$0xff] %v3345_v24  ;;  %3092 = vmatprep.subr.bf16.mxu1 %v3307_v30  ;;  %vm3543_vm4 = vcmp.eq.s32.totalorder %v675_v47, 0  ;;  %v710_v63 = vand.u32 15, %v644_v54  ;;  %v3315_v0 = vld [vmem:[%s4176_s2 + $0x30] sm:$0xff]   ;;  %v654_v33 = vadd.s32 120, %v3484_v29 }
  0x10   : > { %v3288_v4 = vld [vmem:[%s3407_s9] sm:$0xff]   ;;  %2998 = vmatprep.subr.bf16.mxu0 %v3283_v3  ;;  %v3289_v9 = vld [vmem:[%s3407_s9 + $0x8] sm:$0xff]   ;;  %v3290_v10 = vld [vmem:[%s3407_s9 + $0x10] sm:$0xff]   ;;  %1331 = vst [vmem:[#allocation2 + $0xa0] sm:$0xff] %v3345_v24  ;;  %vm3558_vm5 = vcmp.eq.s32.totalorder %v724_v60, 15  ;;  %v652_v39 = vadd.s32 104, %v3484_v29 }
  0x11   : > { %3008 = vmatprep.mubr.bf16.mxu0 %v3288_v4  ;;  %v3291_v11 = vld [vmem:[%s3407_s9 + $0x18] sm:$0xff]   ;;  %v3292_v12 = vld [vmem:[%s3407_s9 + $0x20] sm:$0xff]   ;;  %v3293_v13 = vld [vmem:[%s3407_s9 + $0x28] sm:$0xff]   ;;  %1332 = vst [vmem:[#allocation2 + $0xa8] sm:$0xff] %v3345_v24  ;;  %vm3569_vm6 = vcmp.eq.s32.totalorder %v710_v63, 15  ;;  %v658_v53 = vadd.s32 152, %v3484_v29 }
  0x12   : > { %v3294_v14 = vld [vmem:[%s3407_s9 + $0x30] sm:$0xff]   ;;  %v3295_v15 = vld [vmem:[%s3407_s9 + $0x38] sm:$0xff]   ;;  %v3296_v16 = vld [vmem:[%s3407_s9 + $0x40] sm:$0xff]   ;;  %1333 = vst [vmem:[#allocation2 + $0xb0] sm:$0xff] %v3345_v24  ;;  %3093 = vmatpush3.bf16.msra.mxu1 %v3307_v30  ;;  %v649_v54 = vadd.s32 80, %v3484_v29  ;;  %v647_v60 = vadd.s32 64, %v3484_v29 }
  0x13   : > { %2999 = vmatpush3.bf16.msra.mxu0 %v3283_v3  ;;  %v3297_v17 = vld [vmem:[%s3407_s9 + $0x48] sm:$0xff]   ;;  %v3298_v18 = vld [vmem:[%s3407_s9 + $0x50] sm:$0xff]   ;;  %v3299_v19 = vld [vmem:[%s3407_s9 + $0x58] sm:$0xff]   ;;  %1334 = vst [vmem:[#allocation2 + $0xb8] sm:$0xff] %v3345_v24  ;;  %3094 = vmatprep.subr.bf16.mxu1 %v3309_v35  ;;  %v808_v62 = vand.u32 15, %v658_v53  ;;  %v668_v52 = vadd.s32 232, %v3484_v29 }
  0x14   : > { %3000 = vmatprep.subr.bf16.mxu0 %v3284_v5  ;;  %v3300_v20 = vld [vmem:[%s3407_s9 + $0x60] sm:$0xff]   ;;  %v3301_v21 = vld [vmem:[%s3407_s9 + $0x68] sm:$0xff]   ;;  %v3302_v22 = vld [vmem:[%s3407_s9 + $0x70] sm:$0xff]   ;;  %1335 = vst [vmem:[#allocation2 + $0xc0] sm:$0xff] %v3345_v24  ;;  %v745_v63 = vand.u32 15, %v649_v54  ;;  %s4210_s22 = smov (!%p248_p4, %s3390_s22), 1 }
  0x15   : > { %v3303_v23 = vld [vmem:[%s3407_s9 + $0x78] sm:$0xff]   ;;  %1336 = vst [vmem:[#allocation2 + $0xc8] sm:$0xff] %v3345_v24  ;;  %1337 = vst [vmem:[#allocation2 + $0xd0] sm:$0xff] %v3345_v24  ;;  %vm3687_vm13 = vcmp.eq.s32.totalorder %v808_v62, 15  ;;  %s2794_s24 = sshll.u32 %s4210_s22, 3 }
  0x16   : > { %1338 = vst [vmem:[#allocation2 + $0xd8] sm:$0xff] %v3345_v24  ;;  %1339 = vst [vmem:[#allocation2 + $0xe0] sm:$0xff] %v3345_v24  ;;  %3095 = vmatpush3.bf16.msra.mxu1 %v3309_v35  ;;  %v3319_v34 = vld [vmem:[%s4176_s2 + $0x78] sm:$0xff]   ;;  %vm1193_vm14 = vcmp.eq.s32.totalorder %v745_v63, 0  ;;  %s251_s29 = scalar_lea.vmem %s4180_s6, %s2794_s24 }
  0x17   : > { %3001 = vmatpush3.bf16.msra.mxu0 %v3284_v5  ;;  %1340 = vst [vmem:[#allocation2 + $0xe8] sm:$0xff] %v3345_v24  ;;  %1341 = vst [vmem:[#allocation2 + $0xf0] sm:$0xff] %v3345_v24  ;;  %3096 = vmatprep.subr.bf16.mxu1 %v3311_v40 }
  0x18   : > { %3002 = vmatprep.subr.bf16.mxu0 %v3285_v6  ;;  %1342 = vst [vmem:[#allocation2 + $0xf8] sm:$0xff] %v3345_v24  ;;  %1343 = vst [vmem:[#allocation2 + $0x100] sm:$0xff] %v3345_v24 }
  0x19   : > { %1344 = vst [vmem:[#allocation2 + $0x108] sm:$0xff] %v3345_v24  ;;  %1345 = vst [vmem:[#allocation2 + $0x110] sm:$0xff] %v3345_v24 }
  0x1a   : > { %1346 = vst [vmem:[#allocation2 + $0x118] sm:$0xff] %v3345_v24  ;;  %3097 = vmatpush3.bf16.msra.mxu1 %v3311_v40 }
  0x1b   : > { %3003 = vmatpush3.bf16.msra.mxu0 %v3285_v6  ;;  %3098 = vmatprep.subr.bf16.mxu1 %v3313_v55 }
  0x1c   : > { %3004 = vmatprep.subr.bf16.mxu0 %v3286_v7 }
  0x1e   : > { %3099 = vmatpush3.bf16.msra.mxu1 %v3313_v55 }
  0x1f   : > { %3005 = vmatpush3.bf16.msra.mxu0 %v3286_v7  ;;  %3100 = vmatprep.subr.bf16.mxu1 %v3315_v0 }
  0x20   : > { %3006 = vmatprep.subr.bf16.mxu0 %v3287_v8 }
  0x22   : > { %3101 = vmatpush3.bf16.msra.mxu1 %v3315_v0 }
  0x23   : > { %3007 = vmatpush3.bf16.msra.mxu0 %v3287_v8  ;;  %v650_v8 = vadd.s32 88, %v3484_v29 }
  0x24   : > { %3040 = vmatprep.subr.bf16.mxu0 %v3306_v28 }
  0x26   : > { %3009 = vmatmul.mubr.bf16.vlgmr.msra.gmra.mrb[0].mxu0 %v3289_v9  ;;  %v3316_v9 = vld [vmem:[%s4176_s2 + $0x68] sm:$0xff]  }
  0x27   : > { %3012 = vmatprep.mubr.bf16.mxu0 %v3290_v10  ;;  %3041 = vmatpush3.bf16.msra.mxu0 %v3306_v28 }
  0x28   : > { %3042 = vmatprep.subr.bf16.mxu0 %v3308_v32 }
  0x2b   : > { %3043 = vmatpush3.bf16.msra.mxu0 %v3308_v32  ;;  %v664_v32 = vadd.s32 200, %v3484_v29 }
  0x2c   : > { %3044 = vmatprep.subr.bf16.mxu0 %v3310_v37 }
  0x2d   : > { %v850_v38 = vand.u32 15, %v664_v32 }
  0x2e   : > { %3013 = vmatmul.mubr.bf16.gmra.mrb[4].mxu0 %v3291_v11 }
  0x2f   : > { %3016 = vmatprep.mubr.bf16.mxu0 %v3292_v12  ;;  %3045 = vmatpush3.bf16.msra.mxu0 %v3310_v37 }
  0x30   : > { %3046 = vmatprep.subr.bf16.mxu0 %v3312_v49 }
  0x33   : > { %3047 = vmatpush3.bf16.msra.mxu0 %v3312_v49 }
  0x34   : > { %3048 = vmatprep.subr.bf16.mxu0 %v3314_v61 }
  0x36   : > { %3017 = vmatmul.mubr.bf16.gmra.mrb[8].mxu0 %v3293_v13  ;;  %v645_v13 = vadd.s32 48, %v3484_v29 }
  0x37   : > { %3020 = vmatprep.mubr.bf16.mxu0 %v3294_v14  ;;  %3049 = vmatpush3.bf16.msra.mxu0 %v3314_v61  ;;  %v648_v14 = vadd.s32 72, %v3484_v29 }
  0x38   : > { %3050 = vmatprep.subr.bf16.mxu0 %v3316_v9 }
  0x3b   : > { %3051 = vmatpush3.bf16.msra.mxu0 %v3316_v9 }
  0x3e   : > { %3021 = vmatmul.mubr.bf16.gmra.mrb[12].mxu0 %v3295_v15  ;;  %v3317_v15 = vld [vmem:[%s4176_s2 + $0x38] sm:$0xff]  }
  0x3f   : > { %3024 = vmatprep.mubr.bf16.mxu0 %v3296_v16  ;;  %3102 = vmatprep.subr.bf16.mxu1 %v3317_v15 }
  0x40   : > { %3103 = vmatpush3.bf16.msra.mxu1 %v3317_v15 }
  0x46   : > { %3025 = vmatmul.mubr.bf16.gmra.mrb[16].mxu0 %v3297_v17 }
  0x47   : > { %3028 = vmatprep.mubr.bf16.mxu0 %v3298_v18 }
  0x4e   : > { %3029 = vmatmul.mubr.bf16.gmra.mrb[20].mxu0 %v3299_v19  ;;  %v643_v19 = vadd.s32 32, %v3484_v29 }
  0x4f   : > { %3032 = vmatprep.mubr.bf16.mxu0 %v3300_v20  ;;  %v752_v20 = vand.u32 15, %v650_v8  ;;  %v662_v8 = vadd.s32 184, %v3484_v29 }
  0x50   : > { %v703_v28 = vand.u32 15, %v643_v19 }
  0x51   : > { %vm3605_vm7 = vcmp.eq.s32.totalorder %v752_v20, 15 }
  0x52   : > { %vm1187_vm10 = vcmp.eq.s32.totalorder %v703_v28, 0 }
  0x56   : > { %3033 = vmatmul.mubr.bf16.gmra.mrb[24].mxu0 %v3301_v21  ;;  %v3318_v21 = vld [vmem:[%s4176_s2 + $0x70] sm:$0xff]  }
  0x57   : > { %3036 = vmatprep.mubr.bf16.mxu0 %v3302_v22  ;;  %v717_v22 = vand.u32 15, %v645_v13  ;;  %3052 = vmatprep.subr.bf16.mxu0 %v3318_v21 }
  0x58   : > { %3053 = vmatpush3.bf16.msra.mxu0 %v3318_v21 }
  0x59   : > { %vm3615_vm8 = vcmp.eq.s32.totalorder %v717_v22, 0  ;;  %3054 = vmatprep.subr.bf16.mxu0 %v3319_v34 }
  0x5c   : > { %3055 = vmatpush3.bf16.msra.mxu0 %v3319_v34  ;;  %v651_v34 = vadd.s32 96, %v3484_v29 }
  0x5d   : > { %3184 = vmatprep.subr.bf16.mxu0 %v3345_v24 }
  0x5e   : > { %3037 = vmatmul.mubr.bf16.gmra.mrb[28].mxu0 %v3303_v23  ;;  %v738_v23 = vand.u32 15, %v648_v14 }
  0x60   : > { %vm3621_vm9 = vcmp.eq.s32.totalorder %v738_v23, 15 }
  0xf9   : > { %v3010_v41 = vpop.f32.mrb[0].mxu0 }
  0xfa   : > { %v608_v42 = vmax.f32 %v3010_v41, 0.0  ;;  %v479_v43 = vpop.f32.mrb[1].mxu0 }
  0xfb   : > { %v606_v44 = vmax.f32 %v479_v43, 0.0  ;;  %v3011_v45 = vpop.f32.mrb[2].mxu0 }
  0xfc   : > { %v609_v50 = vmax.f32 %v3011_v45, 0.0  ;;  %1418 = vrot.lane.b32.xlu1 %v608_v42, %s3346_s16  ;;  %v482_v51 = vpop.f32.mrb[3].mxu0  ;;  %1352 = vst.msk [vmem:[#allocation2 + $0x29] sm:$0xff] %vm1349_vm0, %v608_v42  ;;  %v1281_v59 = vsel %vm3518_vm3, 0.0, %v608_v42  ;;  %v766_v45 = vand.u32 15, %v652_v39 }
  0xfd   : > { %v3527_v56 = vmax.f32 %v482_v51, 0.0  ;;  %1414 = vrot.lane.b32.xlu0 %v606_v44, %s3346_s16  ;;  %1350 = vst.msk [vmem:[#allocation2 + $0x19] sm:$0xff] %vm1349_vm0, %v606_v44  ;;  %v1279_v4 = vsel %vm3543_vm4, 0.0, %v606_v44  ;;  %v780_v44 = vand.u32 15, %v654_v33 }
  0xfe   : > { %v1154_v57 = vsel %vm3504_vm1, 0.0, %v609_v50  ;;  %vm1068_vm12 = vcmp.eq.s32.totalorder %v766_v45, 15 }
  0xff   : > { %v1152_v58 = vsel %vm3514_vm2, 0.0, %v3527_v56  ;;  %1353 = vst.msk [vmem:[#allocation2 + $0x31] sm:$0xff] %vm1349_vm0, %v1154_v57  ;;  %vm3654_vm11 = vcmp.eq.s32.totalorder %v780_v44, 15  ;;  %v656_v57 = vadd.s32 136, %v3484_v29 }
 0x100   : > { %1579 = vrot.lane.b32.xlu1 %v1281_v59, %s3347_s23  ;;  %1351 = vst.msk [vmem:[#allocation2 + $0x21] sm:$0xff] %vm1349_vm0, %v1152_v58 }
 0x101   : > { %1420 = vrot.lane.b32.xlu0 %v609_v50, %s3346_s16  ;;  %v3014_v1 = vpop.f32.mrb[4].mxu0  ;;  %v794_v0 = vand.u32 15, %v656_v57 }
 0x102   : > { %v3552_v2 = vmax.f32 %v3014_v1, 0.0  ;;  %v495_v3 = vpop.f32.mrb[5].mxu0 }
 0x103   : > { %v3556_v5 = vmax.f32 %v495_v3, 0.0  ;;  %v3015_v6 = vpop.f32.mrb[6].mxu0  ;;  %vm1072_vm15 = vcmp.eq.s32.totalorder %v794_v0, 15 }
 0x104   : > { %1575 = vrot.lane.b32.xlu1 %v1279_v4, %s3347_s23  ;;  %v3567_v10 = vmax.f32 %v3015_v6, 0.0  ;;  %v498_v11 = vpop.f32.mrb[7].mxu0  ;;  %1356 = vst.msk [vmem:[#allocation2 + $0x49] sm:$0xff] %vm1349_vm0, %v3552_v2  ;;  %v1285_v42 = vsel %vm3615_vm8, 0.0, %v3552_v2  ;;  %v731_v4 = vand.u32 15, %v647_v60 }
 0x105   : > { %1581 = vrot.lane.b32.xlu0 %v609_v50, %s3347_s23  ;;  %v3581_v16 = vmax.f32 %v498_v11, 0.0  ;;  %1354 = vst.msk [vmem:[#allocation2 + $0x39] sm:$0xff] %vm1349_vm0, %v3556_v5  ;;  %v1283_v49 = vsel %vm1187_vm10, 0.0, %v3556_v5  ;;  %v660_v11 = vadd.s32 168, %v3484_v29 }
 0x106   : > { %v1158_v17 = vsel %vm3558_vm5, 0.0, %v3567_v10  ;;  %vm1191_vm1 = vcmp.eq.s32.totalorder %v731_v4, 0 }
 0x107   : > { %v1156_v18 = vsel %vm3569_vm6, 0.0, %v3581_v16  ;;  %1357 = vst.msk [vmem:[#allocation2 + $0x51] sm:$0xff] %vm1349_vm0, %v1158_v17  ;;  %v836_v17 = vand.u32 15, %v662_v8  ;;  %vm1080_vm6 = vcmp.eq.s32.totalorder %v850_v38, 15 }
 0x108   : > { %1426 = vrot.lane.b32.xlu1 %v3552_v2, %s3346_s16  ;;  %1355 = vst.msk [vmem:[#allocation2 + $0x41] sm:$0xff] %vm1349_vm0, %v1156_v18 }
 0x109   : > { %1416 = vrot.lane.b32.xlu0 %v3527_v56, %s3346_s16  ;;  %v3018_v25 = vpop.f32.mrb[8].mxu0  ;;  %vm3720_vm2 = vcmp.eq.s32.totalorder %v836_v17, 15 }
 0x10a   : > { %v3601_v26 = vmax.f32 %v3018_v25, 0.0  ;;  %v511_v27 = vpop.f32.mrb[9].mxu0  ;;  %v669_v25 = vadd.s32 240, %v3484_v29 }
 0x10b   : > { %v3603_v30 = vmax.f32 %v511_v27, 0.0  ;;  %v3019_v31 = vpop.f32.mrb[10].mxu0  ;;  %v653_v27 = vadd.s32 112, %v3484_v29 }
 0x10c   : > { %1422 = vrot.lane.b32.xlu1 %v3556_v5, %s3346_s16  ;;  %v3619_v36 = vmax.f32 %v3019_v31, 0.0  ;;  %v514_v37 = vpop.f32.mrb[11].mxu0  ;;  %1360 = vst.msk [vmem:[#allocation2 + $0x69] sm:$0xff] %vm1349_vm0, %v3601_v26  ;;  %v1289_v14 = vsel %vm1193_vm14, 0.0, %v3601_v26 }
 0x10d   : > { %1577 = vrot.lane.b32.xlu0 %v3527_v56, %s3347_s23  ;;  %v3630_v40 = vmax.f32 %v514_v37, 0.0  ;;  %1358 = vst.msk [vmem:[#allocation2 + $0x59] sm:$0xff] %vm1349_vm0, %v3603_v30  ;;  %v1287_v21 = vsel %vm1191_vm1, 0.0, %v3603_v30 }
 0x10e   : > { %v1162_v41 = vsel %vm3605_vm7, 0.0, %v3619_v36 }
 0x10f   : > { %v1160_v43 = vsel %vm3621_vm9, 0.0, %v3630_v40  ;;  %1361 = vst.msk [vmem:[#allocation2 + $0x71] sm:$0xff] %vm1349_vm0, %v1162_v41 }
 0x110   : > { %1587 = vrot.lane.b32.xlu1 %v1285_v42, %s3347_s23  ;;  %1359 = vst.msk [vmem:[#allocation2 + $0x61] sm:$0xff] %vm1349_vm0, %v1160_v43  ;;  %v759_v43 = vand.u32 15, %v651_v34 }
 0x111   : > { %1428 = vrot.lane.b32.xlu0 %v3567_v10, %s3346_s16  ;;  %v3022_v46 = vpop.f32.mrb[12].mxu0 }
 0x112   : > { %v3649_v47 = vmax.f32 %v3022_v46, 0.0  ;;  %v527_v48 = vpop.f32.mrb[13].mxu0  ;;  %vm1195_vm7 = vcmp.eq.s32.totalorder %v759_v43, 0 }
 0x113   : > { %v3652_v50 = vmax.f32 %v527_v48, 0.0  ;;  %v3023_v51 = vpop.f32.mrb[14].mxu0  ;;  %v670_v48 = vadd.s32 248, %v3484_v29 }
 0x114   : > { %1583 = vrot.lane.b32.xlu1 %v1283_v49, %s3347_s23  ;;  %v3661_v55 = vmax.f32 %v3023_v51, 0.0  ;;  %v530_v56 = vpop.f32.mrb[15].mxu0  ;;  %1364 = vst.msk [vmem:[#allocation2 + $0x89] sm:$0xff] %vm1349_vm0, %v3649_v47 }
 0x115   : > { %1589 = vrot.lane.b32.xlu0 %v3567_v10, %s3347_s23  ;;  %v3668_v58 = vmax.f32 %v530_v56, 0.0  ;;  %1362 = vst.msk [vmem:[#allocation2 + $0x79] sm:$0xff] %vm1349_vm0, %v3652_v50 }
 0x116   : > { %v1166_v59 = vsel %vm3654_vm11, 0.0, %v3661_v55 }
 0x117   : > { %v1164_v61 = vsel %vm1068_vm12, 0.0, %v3668_v58  ;;  %1365 = vst.msk [vmem:[#allocation2 + $0x91] sm:$0xff] %vm1349_vm0, %v1166_v59  ;;  %v892_v59 = vand.u32 15, %v670_v48 }
 0x118   : > { %1434 = vrot.lane.b32.xlu1 %v3601_v26, %s3346_s16  ;;  %1363 = vst.msk [vmem:[#allocation2 + $0x81] sm:$0xff] %vm1349_vm0, %v1164_v61  ;;  %v666_v26 = vadd.s32 216, %v3484_v29 }
 0x119   : > { %1424 = vrot.lane.b32.xlu0 %v3581_v16, %s3346_s16  ;;  %v3026_v1 = vpop.f32.mrb[16].mxu0  ;;  %vm1086_vm8 = vcmp.eq.s32.totalorder %v892_v59, 15 }
 0x11a   : > { %v3683_v2 = vmax.f32 %v3026_v1, 0.0  ;;  %v543_v3 = vpop.f32.mrb[17].mxu0  ;;  %v864_v37 = vand.u32 15, %v666_v26  ;;  %v657_v1 = vadd.s32 144, %v3484_v29  ;;  %v885_v26 = vand.u32 15, %v669_v25 }
 0x11b   : > { %v3685_v5 = vmax.f32 %v543_v3, 0.0  ;;  %v3027_v6 = vpop.f32.mrb[18].mxu0 }
 0x11c   : > { %1430 = vrot.lane.b32.xlu1 %v3603_v30, %s3346_s16  ;;  %v3694_v9 = vmax.f32 %v3027_v6, 0.0  ;;  %v546_v10 = vpop.f32.mrb[19].mxu0  ;;  %1368 = vst.msk [vmem:[#allocation2 + $0xa9] sm:$0xff] %vm1349_vm0, %v3683_v2  ;;  %vm3753_vm4 = vcmp.eq.s32.totalorder %v864_v37, 15  ;;  %v801_v8 = vand.u32 15, %v657_v1 }
 0x11d   : > { %1585 = vrot.lane.b32.xlu0 %v3581_v16, %s3347_s23  ;;  %v3701_v12 = vmax.f32 %v546_v10, 0.0  ;;  %1366 = vst.msk [vmem:[#allocation2 + $0x99] sm:$0xff] %vm1349_vm0, %v3685_v5  ;;  %v822_v16 = vand.u32 15, %v660_v11  ;;  %v655_v10 = vadd.s32 128, %v3484_v29 }
 0x11e   : > { %v1170_v13 = vsel %vm3687_vm13, 0.0, %v3694_v9  ;;  %vm1201_vm10 = vcmp.eq.s32.totalorder %v801_v8, 0  ;;  %v3326_v8 = vld [vmem:[%s4176_s2 + $0xb0] sm:$0xff]  }
 0x11f   : > { %v1168_v15 = vsel %vm1072_vm15, 0.0, %v3701_v12  ;;  %1369 = vst.msk [vmem:[#allocation2 + $0xb1] sm:$0xff] %vm1349_vm0, %v1170_v13  ;;  %vm1076_vm3 = vcmp.eq.s32.totalorder %v822_v16, 15  ;;  %v787_v11 = vand.u32 15, %v655_v10  ;;  %v1297_v13 = vsel %vm1201_vm10, 0.0, %v3683_v2 }
 0x120   : > { %1595 = vrot.lane.b32.xlu1 %v1289_v14, %s3347_s23  ;;  %1367 = vst.msk [vmem:[#allocation2 + $0xa1] sm:$0xff] %vm1349_vm0, %v1168_v15  ;;  %v661_v15 = vadd.s32 176, %v3484_v29  ;;  %v665_v16 = vadd.s32 208, %v3484_v29  ;;  %vm1510_vm15 = vcmask 523520  }
 0x121   : > { %1436 = vrot.lane.b32.xlu0 %v3619_v36, %s3346_s16  ;;  %v3030_v18 = vpop.f32.mrb[20].mxu0 }
 0x122   : > { %v3715_v19 = vmax.f32 %v3030_v18, 0.0  ;;  %v559_v20 = vpop.f32.mrb[21].mxu0  ;;  %v663_v18 = vadd.s32 192, %v3484_v29 }
 0x123   : > { %v3718_v22 = vmax.f32 %v559_v20, 0.0  ;;  %v3031_v23 = vpop.f32.mrb[22].mxu0 }
 0x124   : > { %1591 = vrot.lane.b32.xlu1 %v1287_v21, %s3347_s23  ;;  %v3727_v28 = vmax.f32 %v3031_v23, 0.0  ;;  %v562_v31 = vpop.f32.mrb[23].mxu0  ;;  %1372 = vst.msk [vmem:[#allocation2 + $0xc9] sm:$0xff] %vm1349_vm0, %v3715_v19 }
 0x125   : > { %1597 = vrot.lane.b32.xlu0 %v3619_v36, %s3347_s23  ;;  %v3734_v30 = vmax.f32 %v562_v31, 0.0  ;;  %1370 = vst.msk [vmem:[#allocation2 + $0xb9] sm:$0xff] %vm1349_vm0, %v3718_v22  ;;  %v773_v36 = vand.u32 15, %v653_v27 }
 0x126   : > { %v1174_v33 = vsel %vm3720_vm2, 0.0, %v3727_v28  ;;  %vm1213_vm2 = vcmp.eq.s32.totalorder %v885_v26, 0 }
 0x127   : > { %v1172_v35 = vsel %vm1076_vm3, 0.0, %v3734_v30  ;;  %1373 = vst.msk [vmem:[#allocation2 + $0xd1] sm:$0xff] %vm1349_vm0, %v1174_v33  ;;  %vm1197_vm5 = vcmp.eq.s32.totalorder %v773_v36, 0  ;;  %vm1671_vm3 = vcmask 785920  }
 0x128   : > { %1442 = vrot.lane.b32.xlu1 %v3649_v47, %s3346_s16  ;;  %1371 = vst.msk [vmem:[#allocation2 + $0xc1] sm:$0xff] %vm1349_vm0, %v1172_v35  ;;  %v1293_v56 = vsel %vm1197_vm5, 0.0, %v3649_v47  ;;  %v1291_v47 = vsel %vm1195_vm7, 0.0, %v3652_v50 }
 0x129   : > { %1432 = vrot.lane.b32.xlu0 %v3630_v40, %s3346_s16  ;;  %v3034_v39 = vpop.f32.mrb[24].mxu0 }
 0x12a   : > { %v3749_v41 = vmax.f32 %v3034_v39, 0.0  ;;  %v575_v42 = vpop.f32.mrb[25].mxu0 }
 0x12b   : > { %v3751_v44 = vmax.f32 %v575_v42, 0.0  ;;  %v3035_v45 = vpop.f32.mrb[26].mxu0 }
 0x12c   : > { %1438 = vrot.lane.b32.xlu1 %v3652_v50, %s3346_s16  ;;  %v3760_v49 = vmax.f32 %v3035_v45, 0.0  ;;  %v578_v51 = vpop.f32.mrb[27].mxu0  ;;  %1376 = vst.msk [vmem:[#allocation2 + $0xe9] sm:$0xff] %vm1349_vm0, %v3749_v41 }
 0x12d   : > { %1593 = vrot.lane.b32.xlu0 %v3630_v40, %s3347_s23  ;;  %v3767_v53 = vmax.f32 %v578_v51, 0.0  ;;  %1374 = vst.msk [vmem:[#allocation2 + $0xd9] sm:$0xff] %vm1349_vm0, %v3751_v44  ;;  %v878_v40 = vand.u32 15, %v668_v52 }
 0x12e   : > { %v1178_v54 = vsel %vm3753_vm4, 0.0, %v3760_v49  ;;  %vm3348_vm4 = vmmov 0  }
 0x12f   : > { %v1176_v57 = vsel %vm1080_vm6, 0.0, %v3767_v53  ;;  %1377 = vst.msk [vmem:[#allocation2 + $0xf1] sm:$0xff] %vm1349_vm0, %v1178_v54  ;;  %vm1084_vm9 = vcmp.eq.s32.totalorder %v878_v40, 15 }
 0x130   : > { %1603 = vrot.lane.b32.xlu1 %v1293_v56, %s3347_s23  ;;  %1375 = vst.msk [vmem:[#allocation2 + $0xe1] sm:$0xff] %vm1349_vm0, %v1176_v57 }
 0x131   : > { %1444 = vrot.lane.b32.xlu0 %v3661_v55, %s3346_s16  ;;  %v3038_v60 = vpop.f32.mrb[28].mxu0 }
 0x132   : > { %v3781_v61 = vmax.f32 %v3038_v60, 0.0  ;;  %v591_v62 = vpop.f32.mrb[29].mxu0  ;;  %v3323_v60 = vld [vmem:[%s4176_s2 + $0x98] sm:$0xff]  }
 0x133   : > { %v3784_v63 = vmax.f32 %v591_v62, 0.0  ;;  %v3039_v0 = vpop.f32.mrb[30].mxu0 }
 0x134   : > { %1599 = vrot.lane.b32.xlu1 %v1291_v47, %s3347_s23  ;;  %v3788_v3 = vmax.f32 %v3039_v0, 0.0  ;;  %v594_v4 = vpop.f32.mrb[31].mxu0  ;;  %1380 = vst.msk [vmem:[#allocation2 + $0x109] sm:$0xff] %vm1349_vm0, %v3781_v61  ;;  %v3324_v47 = vld [vmem:[%s4176_s2 + $0xa0] sm:$0xff]  }
 0x135   : > { %1605 = vrot.lane.b32.xlu0 %v3661_v55, %s3347_s23  ;;  %v3794_v6 = vmax.f32 %v594_v4, 0.0  ;;  %1378 = vst.msk [vmem:[#allocation2 + $0xf9] sm:$0xff] %vm1349_vm0, %v3784_v63  ;;  %v3808_v55 = vld [vmem:[%s4176_s2 + $0x80] sm:$0xff]  }
 0x136   : > { %v1182_v50 = vsel %vm1086_vm8, 0.0, %v3788_v3  ;;  %3136 = vmatprep.subr.bf16.mxu1 %v3808_v55 }
 0x137   : > { %v1180_v7 = vsel %vm1084_vm9, 0.0, %v3794_v6  ;;  %1381 = vst.msk [vmem:[#allocation2 + $0x111] sm:$0xff] %vm1349_vm0, %v1182_v50 }
 0x138   : > { %1450 = vrot.lane.b32.xlu1 %v3683_v2, %s3346_s16  ;;  %1379 = vst.msk [vmem:[#allocation2 + $0x101] sm:$0xff] %vm1349_vm0, %v1180_v7  ;;  %vm1199_vm0 = vcmp.eq.s32.totalorder %v787_v11, 0  ;;  %v659_v2 = vadd.s32 160, %v3484_v29 }
 0x139   : > { %1440 = vrot.lane.b32.xlu0 %v3668_v58, %s3346_s16  ;;  %v1295_v14 = vsel %vm1199_vm0, 0.0, %v3685_v5 }
 0x13c   : > { %1446 = vrot.lane.b32.xlu1 %v3685_v5, %s3346_s16  ;;  %v815_v5 = vand.u32 15, %v659_v2 }
 0x13d   : > { %1601 = vrot.lane.b32.xlu0 %v3668_v58, %s3347_s23  ;;  %v829_v58 = vand.u32 15, %v661_v15  ;;  %v3327_v15 = vld [vmem:[%s4176_s2 + $0xb8] sm:$0xff]  }
 0x13e   : > { %vm1203_vm12 = vcmp.eq.s32.totalorder %v815_v5, 0 }
 0x13f   : > { %vm1205_vm11 = vcmp.eq.s32.totalorder %v829_v58, 0 }
 0x140   : > { %1611 = vrot.lane.b32.xlu1 %v1297_v13, %s3347_s23  ;;  %v1301_v17 = vsel %vm1205_vm11, 0.0, %v3715_v19 }
 0x141   : > { %1452 = vrot.lane.b32.xlu0 %v3694_v9, %s3346_s16 }
 0x144   : > { %1607 = vrot.lane.b32.xlu1 %v1295_v14, %s3347_s23 }
 0x145   : > { %1613 = vrot.lane.b32.xlu0 %v3694_v9, %s3347_s23  ;;  %v1299_v9 = vsel %vm1203_vm12, 0.0, %v3718_v22 }
 0x148   : > { %1458 = vrot.lane.b32.xlu1 %v3715_v19, %s3346_s16  ;;  %v843_v19 = vand.u32 15, %v663_v18 }
 0x149   : > { %1448 = vrot.lane.b32.xlu0 %v3701_v12, %s3346_s16 }
 0x14a   : > { %vm1207_vm14 = vcmp.eq.s32.totalorder %v843_v19, 0 }
 0x14b   : > { %v1303_v21 = vsel %vm1207_vm14, 0.0, %v3751_v44 }
 0x14c   : > { %1454 = vrot.lane.b32.xlu1 %v3718_v22, %s3346_s16  ;;  %v667_v22 = vadd.s32 224, %v3484_v29 }
 0x14d   : > { %1609 = vrot.lane.b32.xlu0 %v3701_v12, %s3347_s23  ;;  %v857_v12 = vand.u32 15, %v665_v16 }
 0x14e   : > { %v871_v23 = vand.u32 15, %v667_v22 }
 0x14f   : > { %vm1209_vm13 = vcmp.eq.s32.totalorder %v857_v12, 0 }
 0x150   : > { %1619 = vrot.lane.b32.xlu1 %v1301_v17, %s3347_s23  ;;  %v1305_v20 = vsel %vm1209_vm13, 0.0, %v3749_v41  ;;  %vm1211_vm1 = vcmp.eq.s32.totalorder %v871_v23, 0 }
 0x151   : > { %1460 = vrot.lane.b32.xlu0 %v3727_v28, %s3346_s16  ;;  %v1307_v31 = vsel %vm1211_vm1, 0.0, %v3784_v63 }
 0x154   : > { %1615 = vrot.lane.b32.xlu1 %v1299_v9, %s3347_s23 }
 0x155   : > { %1621 = vrot.lane.b32.xlu0 %v3727_v28, %s3347_s23 }
 0x158   : > { %1466 = vrot.lane.b32.xlu1 %v3749_v41, %s3346_s16 }
 0x159   : > { %1456 = vrot.lane.b32.xlu0 %v3734_v30, %s3346_s16 }
 0x15c   : > { %1462 = vrot.lane.b32.xlu1 %v3751_v44, %s3346_s16 }
 0x15d   : > { %1617 = vrot.lane.b32.xlu0 %v3734_v30, %s3347_s23  ;;  %v1309_v30 = vsel %vm1213_vm2, 0.0, %v3781_v61 }
 0x160   : > { %1627 = vrot.lane.b32.xlu1 %v1305_v20, %s3347_s23 }
 0x161   : > { %1468 = vrot.lane.b32.xlu0 %v3760_v49, %s3346_s16 }
 0x164   : > { %1623 = vrot.lane.b32.xlu1 %v1303_v21, %s3347_s23 }
 0x165   : > { %1629 = vrot.lane.b32.xlu0 %v3760_v49, %s3347_s23 }
 0x168   : > { %1474 = vrot.lane.b32.xlu1 %v3781_v61, %s3346_s16 }
 0x169   : > { %1464 = vrot.lane.b32.xlu0 %v3767_v53, %s3346_s16 }
 0x16c   : > { %1470 = vrot.lane.b32.xlu1 %v3784_v63, %s3346_s16 }
 0x16d   : > { %1625 = vrot.lane.b32.xlu0 %v3767_v53, %s3347_s23  ;;  %v3322_v53 = vld [vmem:[%s4176_s2 + $0x90] sm:$0xff]  }
 0x16e   : > { %v1419_v27 = vpop.permute.xlu1 %1418 }
 0x16f   : > { %1513 = vst.msk [vmem:[#allocation2 + $0x28] sm:$0xff] %vm1510_vm15, %v1419_v27  ;;  %v1415_v28 = vpop.permute.xlu0 %1414 }
 0x170   : > { %1511 = vst.msk [vmem:[#allocation2 + $0x18] sm:$0xff] %vm1510_vm15, %v1415_v28  ;;  %1631 = vrot.lane.b32.xlu1 %v1307_v31, %s3347_s23 }
 0x171   : > { %1472 = vrot.lane.b32.xlu0 %v3794_v6, %s3346_s16 }
 0x172   : > { %v1580_v29 = vpop.permute.xlu1 %1579 }
 0x173   : > { %v1421_v32 = vpop.permute.xlu0 %1420 }
 0x174   : > { %1514 = vst.msk [vmem:[#allocation2 + $0x30] sm:$0xff] %vm1510_vm15, %v1421_v32  ;;  %1635 = vrot.lane.b32.xlu1 %v1309_v30, %s3347_s23 }
 0x175   : > { %1633 = vrot.lane.b32.xlu0 %v3794_v6, %s3347_s23  ;;  %v3325_v6 = vld [vmem:[%s4176_s2 + $0xa8] sm:$0xff]  }
 0x176   : > { %v1576_v33 = vpop.permute.xlu1 %1575 }
 0x177   : > { %1672 = vst.msk [vmem:[#allocation2 + $0x17] sm:$0xff] %vm1671_vm3, %v1576_v33  ;;  %v1582_v34 = vpop.permute.xlu0 %1581 }
 0x178   : > { %1675 = vst.msk [vmem:[#allocation2 + $0x2f] sm:$0xff] %vm1671_vm3, %v1582_v34  ;;  %1637 = vrot.lane.b32.xlu1 %v3788_v3, %s3347_s23 }
 0x179   : > { %1476 = vrot.lane.b32.xlu0 %v3788_v3, %s3346_s16 }
 0x17a   : > { %v1427_v35 = vpop.permute.xlu1 %1426 }
 0x17b   : > { %1517 = vst.msk [vmem:[#allocation2 + $0x48] sm:$0xff] %vm1510_vm15, %v1427_v35  ;;  %v1417_v37 = vpop.permute.xlu0 %1416 }
 0x17c   : > { %1512 = vst.msk [vmem:[#allocation2 + $0x20] sm:$0xff] %vm1510_vm15, %v1417_v37 }
 0x17d   : > { %1674 = vst.msk [vmem:[#allocation2 + $0x27] sm:$0xff] %vm1671_vm3, %v1580_v29 }
 0x17e   : > { %v1423_v36 = vpop.permute.xlu1 %1422  ;;  %v1705_v38 = vld [vmem:[#allocation2 + $0x10] sm:$0xff] }
 0x17f   : > { %1515 = vst.msk [vmem:[#allocation2 + $0x38] sm:$0xff] %vm1510_vm15, %v1423_v36  ;;  %v1578_v39 = vpop.permute.xlu0 %1577  ;;  %v1736_v41 = vpack.c.bf16 %v1705_v38, %v3345_v24  ;;  %v3321_v24 = vld [vmem:[%s4176_s2 + $0x88] sm:$0xff]  }
 0x180   : > { %1673 = vst.msk [vmem:[#allocation2 + $0x1f] sm:$0xff] %vm1671_vm3, %v1578_v39 }
 0x181   : > { %3104 = vmatprep.mubr.bf16.mxu1 %v1736_v41 }
 0x182   : > { %v1588_v42 = vpop.permute.xlu1 %1587 }
 0x183   : > { %v1429_v43 = vpop.permute.xlu0 %1428 }
 0x184   : > { %1518 = vst.msk [vmem:[#allocation2 + $0x50] sm:$0xff] %vm1510_vm15, %v1429_v43  ;;  %v1708_v56 = vld [vmem:[#allocation2 + $0x28] sm:$0xff] }
 0x186   : > { %v1584_v44 = vpop.permute.xlu1 %1583 }
 0x187   : > { %1676 = vst.msk [vmem:[#allocation2 + $0x37] sm:$0xff] %vm1671_vm3, %v1584_v44  ;;  %v1590_v45 = vpop.permute.xlu0 %1589  ;;  %v1706_v46 = vld [vmem:[#allocation2 + $0x18] sm:$0xff]  ;;  %v1707_v48 = vld [vmem:[#allocation2 + $0x20] sm:$0xff] }
 0x188   : > { %1679 = vst.msk [vmem:[#allocation2 + $0x4f] sm:$0xff] %vm1671_vm3, %v1590_v45  ;;  %v1737_v49 = vpack.c.bf16 %v1707_v48, %v1706_v46 }
 0x18a   : > { %3056 = vmatprep.mubr.bf16.mxu0 %v1737_v49  ;;  %3105 = vmatmul.mubr.bf16.vlgmr.msra.gmra.mrb[0].mxu1 %v1737_v49  ;;  %v1435_v51 = vpop.permute.xlu1 %1434 }
 0x18b   : > { %1521 = vst.msk [vmem:[#allocation2 + $0x68] sm:$0xff] %vm1510_vm15, %v1435_v51  ;;  %v1425_v52 = vpop.permute.xlu0 %1424  ;;  %3137 = vmatpush3.bf16.msra.mxu1 %v3808_v55 }
 0x18c   : > { %1516 = vst.msk [vmem:[#allocation2 + $0x40] sm:$0xff] %vm1510_vm15, %v1425_v52  ;;  %3138 = vmatprep.subr.bf16.mxu1 %v3321_v24 }
 0x18d   : > { %1678 = vst.msk [vmem:[#allocation2 + $0x47] sm:$0xff] %vm1671_vm3, %v1588_v42 }
 0x18e   : > { %v1431_v54 = vpop.permute.xlu1 %1430  ;;  %v1709_v57 = vld [vmem:[#allocation2 + $0x30] sm:$0xff] }
 0x18f   : > { %1519 = vst.msk [vmem:[#allocation2 + $0x58] sm:$0xff] %vm1510_vm15, %v1431_v54  ;;  %v1586_v59 = vpop.permute.xlu0 %1585  ;;  %v3908_v40 = vpack.c.bf16 %v1709_v57, %v1708_v56  ;;  %3139 = vmatpush3.bf16.msra.mxu1 %v3321_v24 }
 0x190   : > { %1677 = vst.msk [vmem:[#allocation2 + $0x3f] sm:$0xff] %vm1671_vm3, %v1586_v59  ;;  %3140 = vmatprep.subr.bf16.mxu1 %v3322_v53 }
 0x191   : > { %3057 = vmatmul.mubr.bf16.vlgmr.msra.gmra.mrb[32].mxu0 %v3908_v40  ;;  %3108 = vmatprep.mubr.bf16.mxu1 %v3908_v40 }
 0x192   : > { %v1596_v61 = vpop.permute.xlu1 %1595 }
 0x193   : > { %v1437_v62 = vpop.permute.xlu0 %1436  ;;  %3141 = vmatpush3.bf16.msra.mxu1 %v3322_v53 }
 0x194   : > { %1522 = vst.msk [vmem:[#allocation2 + $0x70] sm:$0xff] %vm1510_vm15, %v1437_v62  ;;  %3142 = vmatprep.subr.bf16.mxu1 %v3323_v60  ;;  %v1712_v55 = vld [vmem:[#allocation2 + $0x48] sm:$0xff] }
 0x196   : > { %v1592_v63 = vpop.permute.xlu1 %1591 }
 0x197   : > { %1680 = vst.msk [vmem:[#allocation2 + $0x57] sm:$0xff] %vm1671_vm3, %v1592_v63  ;;  %v1598_v0 = vpop.permute.xlu0 %1597  ;;  %v1710_v1 = vld [vmem:[#allocation2 + $0x38] sm:$0xff]  ;;  %v1711_v3 = vld [vmem:[#allocation2 + $0x40] sm:$0xff]  ;;  %3143 = vmatpush3.bf16.msra.mxu1 %v3323_v60 }
 0x198   : > { %1683 = vst.msk [vmem:[#allocation2 + $0x6f] sm:$0xff] %vm1671_vm3, %v1598_v0  ;;  %v3922_v4 = vpack.c.bf16 %v1711_v3, %v1710_v1  ;;  %3144 = vmatprep.subr.bf16.mxu1 %v3324_v47 }
 0x19a   : > { %3060 = vmatprep.mubr.bf16.mxu0 %v3922_v4  ;;  %3109 = vmatmul.mubr.bf16.gmra.mrb[4].mxu1 %v3922_v4  ;;  %v1443_v50 = vpop.permute.xlu1 %1442 }
 0x19b   : > { %1525 = vst.msk [vmem:[#allocation2 + $0x88] sm:$0xff] %vm1510_vm15, %v1443_v50  ;;  %v1433_v7 = vpop.permute.xlu0 %1432  ;;  %3145 = vmatpush3.bf16.msra.mxu1 %v3324_v47 }
 0x19c   : > { %1520 = vst.msk [vmem:[#allocation2 + $0x60] sm:$0xff] %vm1510_vm15, %v1433_v7  ;;  %3146 = vmatprep.subr.bf16.mxu1 %v3325_v6 }
 0x19d   : > { %1682 = vst.msk [vmem:[#allocation2 + $0x67] sm:$0xff] %vm1671_vm3, %v1596_v61 }
 0x19e   : > { %v1439_v10 = vpop.permute.xlu1 %1438  ;;  %v1713_v11 = vld [vmem:[#allocation2 + $0x50] sm:$0xff] }
 0x19f   : > { %1523 = vst.msk [vmem:[#allocation2 + $0x78] sm:$0xff] %vm1510_vm15, %v1439_v10  ;;  %v1594_v13 = vpop.permute.xlu0 %1593  ;;  %v3936_v14 = vpack.c.bf16 %v1713_v11, %v1712_v55  ;;  %3147 = vmatpush3.bf16.msra.mxu1 %v3325_v6 }
 0x1a0   : > { %1681 = vst.msk [vmem:[#allocation2 + $0x5f] sm:$0xff] %vm1671_vm3, %v1594_v13  ;;  %3148 = vmatprep.subr.bf16.mxu1 %v3326_v8 }
 0x1a1   : > { %3061 = vmatmul.mubr.bf16.gmra.mrb[36].mxu0 %v3936_v14  ;;  %3112 = vmatprep.mubr.bf16.mxu1 %v3936_v14 }
 0x1a2   : > { %v1604_v58 = vpop.permute.xlu1 %1603 }
 0x1a3   : > { %v1445_v2 = vpop.permute.xlu0 %1444  ;;  %3149 = vmatpush3.bf16.msra.mxu1 %v3326_v8 }
 0x1a4   : > { %1526 = vst.msk [vmem:[#allocation2 + $0x90] sm:$0xff] %vm1510_vm15, %v1445_v2  ;;  %3150 = vmatprep.subr.bf16.mxu1 %v3327_v15  ;;  %v1716_v21 = vld [vmem:[#allocation2 + $0x68] sm:$0xff] }
 0x1a6   : > { %v1600_v5 = vpop.permute.xlu1 %1599 }
 0x1a7   : > { %1684 = vst.msk [vmem:[#allocation2 + $0x77] sm:$0xff] %vm1671_vm3, %v1600_v5  ;;  %v1606_v17 = vpop.permute.xlu0 %1605  ;;  %v1714_v9 = vld [vmem:[#allocation2 + $0x58] sm:$0xff]  ;;  %v1715_v16 = vld [vmem:[#allocation2 + $0x60] sm:$0xff]  ;;  %3151 = vmatpush3.bf16.msra.mxu1 %v3327_v15 }
 0x1a8   : > { %1687 = vst.msk [vmem:[#allocation2 + $0x8f] sm:$0xff] %vm1671_vm3, %v1606_v17  ;;  %v3947_v12 = vpack.c.bf16 %v1715_v16, %v1714_v9 }
 0x1aa   : > { %3064 = vmatprep.mubr.bf16.mxu0 %v3947_v12  ;;  %3113 = vmatmul.mubr.bf16.gmra.mrb[8].mxu1 %v3947_v12  ;;  %v1451_v18 = vpop.permute.xlu1 %1450 }
 0x1ab   : > { %1529 = vst.msk [vmem:[#allocation2 + $0xa8] sm:$0xff] %vm1510_vm15, %v1451_v18  ;;  %v1441_v19 = vpop.permute.xlu0 %1440 }
 0x1ac   : > { %1524 = vst.msk [vmem:[#allocation2 + $0x80] sm:$0xff] %vm1510_vm15, %v1441_v19 }
 0x1ad   : > { %1686 = vst.msk [vmem:[#allocation2 + $0x87] sm:$0xff] %vm1671_vm3, %v1604_v58 }
 0x1ae   : > { %v1447_v20 = vpop.permute.xlu1 %1446  ;;  %v1717_v22 = vld [vmem:[#allocation2 + $0x70] sm:$0xff] }
 0x1af   : > { %1527 = vst.msk [vmem:[#allocation2 + $0x98] sm:$0xff] %vm1510_vm15, %v1447_v20  ;;  %v1602_v23 = vpop.permute.xlu0 %1601  ;;  %v3955_v25 = vpack.c.bf16 %v1717_v22, %v1716_v21 }
 0x1b0   : > { %1685 = vst.msk [vmem:[#allocation2 + $0x7f] sm:$0xff] %vm1671_vm3, %v1602_v23 }
 0x1b1   : > { %3065 = vmatmul.mubr.bf16.gmra.mrb[40].mxu0 %v3955_v25  ;;  %3116 = vmatprep.mubr.bf16.mxu1 %v3955_v25 }
 0x1b2   : > { %v1612_v26 = vpop.permute.xlu1 %1611 }
 0x1b3   : > { %v1453_v27 = vpop.permute.xlu0 %1452 }
 0x1b4   : > { %1530 = vst.msk [vmem:[#allocation2 + $0xb0] sm:$0xff] %vm1510_vm15, %v1453_v27  ;;  %v1720_v37 = vld [vmem:[#allocation2 + $0x88] sm:$0xff] }
 0x1b6   : > { %v1608_v28 = vpop.permute.xlu1 %1607 }
 0x1b7   : > { %1688 = vst.msk [vmem:[#allocation2 + $0x97] sm:$0xff] %vm1671_vm3, %v1608_v28  ;;  %v1614_v31 = vpop.permute.xlu0 %1613  ;;  %v1718_v29 = vld [vmem:[#allocation2 + $0x78] sm:$0xff]  ;;  %v1719_v32 = vld [vmem:[#allocation2 + $0x80] sm:$0xff] }
 0x1b8   : > { %1691 = vst.msk [vmem:[#allocation2 + $0xaf] sm:$0xff] %vm1671_vm3, %v1614_v31  ;;  %v3963_v30 = vpack.c.bf16 %v1719_v32, %v1718_v29  ;;  %v3328_v31 = vld [vmem:[%s4178_s4] sm:$0xff]   ;;  %v3329_v29 = vld [vmem:[%s4178_s4 + $0x8] sm:$0xff]  }
 0x1b9   : > { %3185 = vmatpush3.bf16.msra.mxu0 %v3328_v31 }
 0x1ba   : > { %3068 = vmatprep.mubr.bf16.mxu0 %v3963_v30  ;;  %3117 = vmatmul.mubr.bf16.gmra.mrb[12].mxu1 %v3963_v30  ;;  %v1459_v33 = vpop.permute.xlu1 %1458 }
 0x1bb   : > { %1533 = vst.msk [vmem:[#allocation2 + $0xc8] sm:$0xff] %vm1510_vm15, %v1459_v33  ;;  %v1449_v34 = vpop.permute.xlu0 %1448 }
 0x1bc   : > { %1528 = vst.msk [vmem:[#allocation2 + $0xa0] sm:$0xff] %vm1510_vm15, %v1449_v34 }
 0x1bd   : > { %1690 = vst.msk [vmem:[#allocation2 + $0xa7] sm:$0xff] %vm1671_vm3, %v1612_v26 }
 0x1be   : > { %v1455_v35 = vpop.permute.xlu1 %1454  ;;  %v1721_v36 = vld [vmem:[#allocation2 + $0x90] sm:$0xff] }
 0x1bf   : > { %1531 = vst.msk [vmem:[#allocation2 + $0xb8] sm:$0xff] %vm1510_vm15, %v1455_v35  ;;  %v1610_v38 = vpop.permute.xlu0 %1609  ;;  %v3971_v39 = vpack.c.bf16 %v1721_v36, %v1720_v37  ;;  %v3330_v35 = vld [vmem:[%s4178_s4 + $0x10] sm:$0xff]   ;;  %v3331_v37 = vld [vmem:[%s4178_s4 + $0x18] sm:$0xff]  }
 0x1c0   : > { %1689 = vst.msk [vmem:[#allocation2 + $0x9f] sm:$0xff] %vm1671_vm3, %v1610_v38 }
 0x1c1   : > { %3069 = vmatmul.mubr.bf16.gmra.mrb[44].mxu0 %v3971_v39  ;;  %3120 = vmatprep.mubr.bf16.mxu1 %v3971_v39 }
 0x1c2   : > { %v1620_v41 = vpop.permute.xlu1 %1619 }
 0x1c3   : > { %v1461_v42 = vpop.permute.xlu0 %1460 }
 0x1c4   : > { %1534 = vst.msk [vmem:[#allocation2 + $0xd0] sm:$0xff] %vm1510_vm15, %v1461_v42  ;;  %v1724_v52 = vld [vmem:[#allocation2 + $0xa8] sm:$0xff]  ;;  %v3332_v42 = vld [vmem:[%s4178_s4 + $0x20] sm:$0xff]  }
 0x1c6   : > { %v1616_v43 = vpop.permute.xlu1 %1615 }
 0x1c7   : > { %1692 = vst.msk [vmem:[#allocation2 + $0xb7] sm:$0xff] %vm1671_vm3, %v1616_v43  ;;  %v1622_v44 = vpop.permute.xlu0 %1621  ;;  %v1722_v45 = vld [vmem:[#allocation2 + $0x98] sm:$0xff]  ;;  %v1723_v46 = vld [vmem:[#allocation2 + $0xa0] sm:$0xff] }
 0x1c8   : > { %1695 = vst.msk [vmem:[#allocation2 + $0xcf] sm:$0xff] %vm1671_vm3, %v1622_v44  ;;  %v3979_v48 = vpack.c.bf16 %v1723_v46, %v1722_v45 }
 0x1ca   : > { %3072 = vmatprep.mubr.bf16.mxu0 %v3979_v48  ;;  %3121 = vmatmul.mubr.bf16.gmra.mrb[16].mxu1 %v3979_v48  ;;  %v1467_v49 = vpop.permute.xlu1 %1466 }
 0x1cb   : > { %1537 = vst.msk [vmem:[#allocation2 + $0xe8] sm:$0xff] %vm1510_vm15, %v1467_v49  ;;  %v1457_v24 = vpop.permute.xlu0 %1456  ;;  %v3334_v49 = vld [vmem:[%s4178_s4 + $0x30] sm:$0xff]  }
 0x1cc   : > { %1532 = vst.msk [vmem:[#allocation2 + $0xc0] sm:$0xff] %vm1510_vm15, %v1457_v24  ;;  %v3335_v24 = vld [vmem:[%s4178_s4 + $0x38] sm:$0xff]  }
 0x1cd   : > { %1694 = vst.msk [vmem:[#allocation2 + $0xc7] sm:$0xff] %vm1671_vm3, %v1620_v41 }
 0x1ce   : > { %v1463_v51 = vpop.permute.xlu1 %1462  ;;  %v1725_v53 = vld [vmem:[#allocation2 + $0xb0] sm:$0xff] }
 0x1cf   : > { %1535 = vst.msk [vmem:[#allocation2 + $0xd8] sm:$0xff] %vm1510_vm15, %v1463_v51  ;;  %v1618_v54 = vpop.permute.xlu0 %1617  ;;  %v3987_v56 = vpack.c.bf16 %v1725_v53, %v1724_v52 }
 0x1d0   : > { %1693 = vst.msk [vmem:[#allocation2 + $0xbf] sm:$0xff] %vm1671_vm3, %v1618_v54 }
 0x1d1   : > { %3073 = vmatmul.mubr.bf16.gmra.mrb[48].mxu0 %v3987_v56  ;;  %3124 = vmatprep.mubr.bf16.mxu1 %v3987_v56 }
 0x1d2   : > { %v1628_v57 = vpop.permute.xlu1 %1627 }
 0x1d3   : > { %v1469_v59 = vpop.permute.xlu0 %1468 }
 0x1d4   : > { %1538 = vst.msk [vmem:[#allocation2 + $0xf0] sm:$0xff] %vm1510_vm15, %v1469_v59  ;;  %v1728_v6 = vld [vmem:[#allocation2 + $0xc8] sm:$0xff] }
 0x1d6   : > { %v1624_v60 = vpop.permute.xlu1 %1623 }
 0x1d7   : > { %1696 = vst.msk [vmem:[#allocation2 + $0xd7] sm:$0xff] %vm1671_vm3, %v1624_v60  ;;  %v1630_v61 = vpop.permute.xlu0 %1629  ;;  %v1726_v62 = vld [vmem:[#allocation2 + $0xb8] sm:$0xff]  ;;  %v1727_v47 = vld [vmem:[#allocation2 + $0xc0] sm:$0xff] }
 0x1d8   : > { %1699 = vst.msk [vmem:[#allocation2 + $0xef] sm:$0xff] %vm1671_vm3, %v1630_v61  ;;  %v1747_v63 = vpack.c.bf16 %v1727_v47, %v1726_v62 }
 0x1da   : > { %3076 = vmatprep.mubr.bf16.mxu0 %v1747_v63  ;;  %3125 = vmatmul.mubr.bf16.gmra.mrb[20].mxu1 %v1747_v63  ;;  %v1475_v0 = vpop.permute.xlu1 %1474 }
 0x1db   : > { %1541 = vst.msk [vmem:[#allocation2 + $0x108] sm:$0xff] %vm1510_vm15, %v1475_v0  ;;  %v1465_v1 = vpop.permute.xlu0 %1464 }
 0x1dc   : > { %1536 = vst.msk [vmem:[#allocation2 + $0xe0] sm:$0xff] %vm1510_vm15, %v1465_v1 }
 0x1dd   : > { %1698 = vst.msk [vmem:[#allocation2 + $0xe7] sm:$0xff] %vm1671_vm3, %v1628_v57 }
 0x1de   : > { %v1471_v3 = vpop.permute.xlu1 %1470  ;;  %v1729_v50 = vld [vmem:[#allocation2 + $0xd0] sm:$0xff] }
 0x1df   : > { %1539 = vst.msk [vmem:[#allocation2 + $0xf8] sm:$0xff] %vm1510_vm15, %v1471_v3  ;;  %v1626_v7 = vpop.permute.xlu0 %1625  ;;  %v1748_v8 = vpack.c.bf16 %v1729_v50, %v1728_v6 }
 0x1e0   : > { %1697 = vst.msk [vmem:[#allocation2 + $0xdf] sm:$0xff] %vm1671_vm3, %v1626_v7 }
 0x1e1   : > { %3077 = vmatmul.mubr.bf16.gmra.mrb[52].mxu0 %v1748_v8  ;;  %3128 = vmatprep.mubr.bf16.mxu1 %v1748_v8 }
 0x1e2   : > { %v1632_v10 = vpop.permute.xlu1 %1631 }
 0x1e3   : > { %1700 = vst.msk [vmem:[#allocation2 + $0xf7] sm:$0xff] %vm1671_vm3, %v1632_v10  ;;  %v1473_v55 = vpop.permute.xlu0 %1472 }
 0x1e4   : > { %1540 = vst.msk [vmem:[#allocation2 + $0x100] sm:$0xff] %vm1510_vm15, %v1473_v55  ;;  %v1732_v5 = vld [vmem:[#allocation2 + $0xe8] sm:$0xff] }
 0x1e6   : > { %v1636_v11 = vpop.permute.xlu1 %1635 }
 0x1e7   : > { %1702 = vst.msk [vmem:[#allocation2 + $0x107] sm:$0xff] %vm1671_vm3, %v1636_v11  ;;  %v1634_v13 = vpop.permute.xlu0 %1633  ;;  %v1730_v15 = vld [vmem:[#allocation2 + $0xd8] sm:$0xff]  ;;  %v1731_v58 = vld [vmem:[#allocation2 + $0xe0] sm:$0xff] }
 0x1e8   : > { %1701 = vst.msk [vmem:[#allocation2 + $0xff] sm:$0xff] %vm1671_vm3, %v1634_v13  ;;  %v1749_v2 = vpack.c.bf16 %v1731_v58, %v1730_v15 }
 0x1ea   : > { %3080 = vmatprep.mubr.bf16.mxu0 %v1749_v2  ;;  %3129 = vmatmul.mubr.bf16.gmra.mrb[24].mxu1 %v1749_v2  ;;  %v1733_v17 = vld [vmem:[#allocation2 + $0xf0] sm:$0xff]  ;;  %v1638_v18 = vpop.permute.xlu1 %1637 }
 0x1eb   : > { %v1477_v9 = vpop.permute.xlu0 %1476  ;;  %v1750_v16 = vpack.c.bf16 %v1733_v17, %v1732_v5 }
 0x1ec   : > { %1542 = vst.msk [vmem:[#allocation2 + $0x110] sm:$0xff] %vm1510_vm15, %v1477_v9 }
 0x1ed   : > { %1703 = vst.msk [vmem:[#allocation2 + $0x10f] sm:$0xff] %vm1671_vm3, %v1638_v18  ;;  %3081 = vmatmul.mubr.bf16.gmra.mrb[56].mxu0 %v1750_v16  ;;  %3132 = vmatprep.mubr.bf16.mxu1 %v1750_v16 }
 0x1ef   : > { %v1734_v19 = vld [vmem:[#allocation2 + $0xf8] sm:$0xff]  ;;  %v1735_v20 = vld [vmem:[#allocation2 + $0x100] sm:$0xff] }
 0x1f0   : > { %v1751_v21 = vpack.c.bf16 %v1735_v20, %v1734_v19 }
 0x1f2   : > { %3084 = vmatprep.mubr.bf16.mxu0 %v1751_v21  ;;  %3133 = vmatmul.mubr.bf16.gmra.mrb[28].mxu1 %v1751_v21 }
 0x1f3   : > { %3152 = vmatprep.mubr.bf16.mxu1 %v3908_v40  ;;  %v2236_v40 = vld [vmem:[#allocation2 + $0x118] sm:$0xff] }
 0x1f4   : > { %v1768_v22 = vld [vmem:[#allocation2 + $0x108] sm:$0xff]  ;;  %v1769_v23 = vld [vmem:[#allocation2 + $0x110] sm:$0xff] }
 0x1f5   : > { %v1770_v26 = vpack.c.bf16 %v1769_v23, %v1768_v22 }
 0x1f7   : > { %3085 = vmatmul.mubr.bf16.gmra.mrb[60].mxu0 %v1770_v26 }
 0x1fa   : > { %3153 = vmatmul.mubr.bf16.vlgmr.msra.gmra.mrb[0].mxu1 %v3922_v4  ;;  %v3336_v4 = vld [vmem:[#allocation2] sm:$0xff] }
 0x1fb   : > { %3156 = vmatprep.mubr.bf16.mxu1 %v3936_v14  ;;  %v2253_v14 = vpack.c.bf16 %v3336_v4, %v2236_v40  ;;  %3186 = vmatprep.subr.bf16.mxu0 %v3336_v4 }
 0x1fc   : > { %3187 = vmatpush3.bf16.msra.mxu0 %v3329_v29  ;;  %3200 = vmatprep.mubr.msk.bf16.mxu0 %vm3348_vm4, %v3336_v4 }
 0x1fd   : > { %3188 = vmatprep.subr.bf16.mxu0 %v3336_v4 }
 0x200   : > { %3189 = vmatpush3.bf16.msra.mxu0 %v3330_v35 }
 0x201   : > { %3190 = vmatprep.subr.bf16.mxu0 %v3336_v4 }
 0x202   : > { %3157 = vmatmul.mubr.bf16.gmra.mrb[4].mxu1 %v3947_v12 }
 0x203   : > { %3160 = vmatprep.mubr.bf16.mxu1 %v3955_v25 }
 0x204   : > { %3191 = vmatpush3.bf16.msra.mxu0 %v3331_v37 }
 0x205   : > { %3192 = vmatprep.subr.bf16.mxu0 %v3336_v4 }
 0x208   : > { %3193 = vmatpush3.bf16.msra.mxu0 %v3332_v42 }
 0x209   : > { %3194 = vmatprep.subr.bf16.mxu0 %v3336_v4 }
 0x20a   : > { %3161 = vmatmul.mubr.bf16.gmra.mrb[8].mxu1 %v3963_v30 }
 0x20b   : > { %3164 = vmatprep.mubr.bf16.mxu1 %v3971_v39 }
 0x212   : > { %3165 = vmatmul.mubr.bf16.gmra.mrb[12].mxu1 %v3979_v48  ;;  %v3333_v48 = vld [vmem:[%s4178_s4 + $0x28] sm:$0xff]  }
 0x213   : > { %3168 = vmatprep.mubr.bf16.mxu1 %v3987_v56  ;;  %3195 = vmatpush3.bf16.msra.mxu0 %v3333_v48 }
 0x214   : > { %3196 = vmatprep.subr.bf16.mxu0 %v3336_v4 }
 0x217   : > { %3197 = vmatpush3.bf16.msra.mxu0 %v3334_v49 }
 0x218   : > { %3198 = vmatprep.subr.bf16.mxu0 %v3336_v4 }
 0x21a   : > { %3169 = vmatmul.mubr.bf16.gmra.mrb[16].mxu1 %v1747_v63 }
 0x21b   : > { %3172 = vmatprep.mubr.bf16.mxu1 %v1748_v8  ;;  %3199 = vmatpush3.bf16.msra.mxu0 %v3335_v24  ;;  %v4100_v8 = vld [vmem:[%s4177_s3] ss:$0 sm:$0xff] }
 0x222   : > { %3173 = vmatmul.mubr.bf16.gmra.mrb[20].mxu1 %v1749_v2 }
 0x223   : > { %3176 = vmatprep.mubr.bf16.mxu1 %v1750_v16 }
 0x22a   : > { %3177 = vmatmul.mubr.bf16.gmra.mrb[24].mxu1 %v1751_v21 }
 0x22b   : > { %3180 = vmatprep.mubr.bf16.mxu1 %v1770_v26 }
 0x232   : > { %3181 = vmatmul.mubr.bf16.gmra.mrb[28].mxu1 %v2253_v14 }
 0x264   : > { %v3058_v12 = vpop.f32.mrb[32].mxu0 }
 0x265   : > { %v1870_v25 = vpop.f32.mrb[33].mxu0 }
 0x266   : > { %v3059_v27 = vpop.f32.mrb[34].mxu0 }
 0x267   : > { %v4015_v28 = vpop.f32.mrb[35].mxu0 }
 0x274   : > { %v4023_v32 = vpop.f32.mrb[36].mxu0 }
 0x275   : > { %v4025_v30 = vpop.f32.mrb[37].mxu0 }
 0x276   : > { %v4027_v33 = vpop.f32.mrb[38].mxu0 }
 0x277   : > { %v4029_v34 = vpop.f32.mrb[39].mxu0 }
 0x284   : > { %v4037_v36 = vpop.f32.mrb[40].mxu0 }
 0x285   : > { %v4039_v38 = vpop.f32.mrb[41].mxu0 }
 0x286   : > { %v4041_v39 = vpop.f32.mrb[42].mxu0 }
 0x287   : > { %v4043_v41 = vpop.f32.mrb[43].mxu0 }
 0x294   : > { %v4048_v43 = vpop.f32.mrb[44].mxu0 }
 0x295   : > { %v4050_v44 = vpop.f32.mrb[45].mxu0 }
 0x296   : > { %v4052_v45 = vpop.f32.mrb[46].mxu0 }
 0x297   : > { %v4054_v46 = vpop.f32.mrb[47].mxu0 }
 0x2a4   : > { %v4065_v51 = vpop.f32.mrb[48].mxu0 }
 0x2a5   : > { %v4067_v52 = vpop.f32.mrb[49].mxu0 }
 0x2a6   : > { %v4069_v53 = vpop.f32.mrb[50].mxu0 }
 0x2a7   : > { %v4071_v54 = vpop.f32.mrb[51].mxu0 }
 0x2b4   : > { %v4073_v56 = vpop.f32.mrb[52].mxu0 }
 0x2b5   : > { %v4075_v57 = vpop.f32.mrb[53].mxu0 }
 0x2b6   : > { %v4077_v59 = vpop.f32.mrb[54].mxu0 }
 0x2b7   : > { %v4079_v60 = vpop.f32.mrb[55].mxu0 }
 0x2c0   : > { %v4081_v61 = vpop.f32.mrb[56].mxu0 }
 0x2c1   : > { %v4083_v62 = vpop.f32.mrb[57].mxu0 }
 0x2c2   : > { %v4085_v47 = vpop.f32.mrb[58].mxu0 }
 0x2c3   : > { %v4087_v63 = vpop.f32.mrb[59].mxu0 }
 0x2ca   : > { %v4089_v0 = vpop.f32.mrb[60].mxu0 }
 0x2cb   : > { %v4091_v1 = vpop.f32.mrb[61].mxu0 }
 0x2cc   : > { %v4093_v3 = vpop.f32.mrb[62].mxu0 }
 0x2cd   : > { %v4095_v6 = vpop.f32.mrb[63].mxu0  ;;  %v3154_v50 = vpop.f32.mrb[0].mxu1 }
 0x2ce   : > { %v3204_v7 = vadd.f32 %v3154_v50, %v3058_v12  ;;  %v2353_v10 = vpop.f32.mrb[1].mxu1 }
 0x2cf   : > { %v3205_v55 = vadd.f32 %v2353_v10, %v1870_v25  ;;  %v3155_v11 = vpop.f32.mrb[2].mxu1 }
 0x2d0   : > { %v3206_v13 = vadd.f32 %v3155_v11, %v3059_v27  ;;  %v2356_v15 = vpop.f32.mrb[3].mxu1  ;;  %v2521_v5 = vadd.f32 %v3204_v7, %v4100_v8 }
 0x2d1   : > { %v2519_v58 = vadd.f32 %v3205_v55, %v4100_v8  ;;  %v3207_v2 = vadd.f32 %v2356_v15, %v4015_v28 }
 0x2d2   : > { %v2522_v16 = vadd.f32 %v3206_v13, %v4100_v8  ;;  %v2553_v22 = vmax.f32 %v2521_v5, 0.0 }
 0x2d3   : > { %v2520_v17 = vadd.f32 %v3207_v2, %v4100_v8  ;;  %v2551_v9 = vmax.f32 %v2519_v58, 0.0 }
 0x2d4   : > { %v2554_v12 = vmax.f32 %v2522_v16, 0.0 }
 0x2d5   : > { %v2552_v18 = vmax.f32 %v2520_v17, 0.0  ;;  %v3158_v19 = vpop.f32.mrb[4].mxu1 }
 0x2d6   : > { %v3208_v20 = vadd.f32 %v3158_v19, %v4023_v32  ;;  %v2369_v21 = vpop.f32.mrb[5].mxu1 }
 0x2d7   : > { %v2583_v23 = vadd.f32 %v2552_v18, %v2551_v9  ;;  %v3209_v26 = vadd.f32 %v2369_v21, %v4025_v30  ;;  %v3159_v40 = vpop.f32.mrb[6].mxu1 }
 0x2d8   : > { %v3210_v4 = vadd.f32 %v3159_v40, %v4027_v33  ;;  %v2372_v14 = vpop.f32.mrb[7].mxu1  ;;  %v2525_v31 = vadd.f32 %v3208_v20, %v4100_v8 }
 0x2d9   : > { %v2584_v25 = vadd.f32 %v2583_v23, %v2553_v22  ;;  %v2523_v27 = vadd.f32 %v3209_v26, %v4100_v8  ;;  %v3211_v28 = vadd.f32 %v2372_v14, %v4029_v34 }
 0x2da   : > { %v2526_v42 = vadd.f32 %v3210_v4, %v4100_v8  ;;  %v2557_v24 = vmax.f32 %v2525_v31, 0.0 }
 0x2db   : > { %v2555_v29 = vmax.f32 %v2523_v27, 0.0  ;;  %v2585_v35 = vadd.f32 %v2584_v25, %v2554_v12  ;;  %v2524_v32 = vadd.f32 %v3211_v28, %v4100_v8 }
 0x2dc   : > { %v2558_v11 = vmax.f32 %v2526_v42, 0.0 }
 0x2dd   : > { %v2586_v37 = vadd.f32 %v2585_v35, %v2555_v29  ;;  %v2556_v30 = vmax.f32 %v2524_v32, 0.0  ;;  %v3162_v48 = vpop.f32.mrb[8].mxu1 }
 0x2de   : > { %v3212_v33 = vadd.f32 %v3162_v48, %v4037_v36  ;;  %v2385_v49 = vpop.f32.mrb[9].mxu1 }
 0x2df   : > { %v2587_v50 = vadd.f32 %v2586_v37, %v2556_v30  ;;  %v3213_v7 = vadd.f32 %v2385_v49, %v4039_v38  ;;  %v3163_v10 = vpop.f32.mrb[10].mxu1 }
 0x2e0   : > { %v3214_v34 = vadd.f32 %v3163_v10, %v4041_v39  ;;  %v2388_v55 = vpop.f32.mrb[11].mxu1  ;;  %v2529_v2 = vadd.f32 %v3212_v33, %v4100_v8 }
 0x2e1   : > { %v2588_v13 = vadd.f32 %v2587_v50, %v2557_v24  ;;  %v2527_v15 = vadd.f32 %v3213_v7, %v4100_v8  ;;  %v3215_v58 = vadd.f32 %v2388_v55, %v4043_v41 }
 0x2e2   : > { %v2530_v16 = vadd.f32 %v3214_v34, %v4100_v8  ;;  %v2561_v20 = vmax.f32 %v2529_v2, 0.0 }
 0x2e3   : > { %v2559_v5 = vmax.f32 %v2527_v15, 0.0  ;;  %v2589_v17 = vadd.f32 %v2588_v13, %v2558_v11  ;;  %v2528_v36 = vadd.f32 %v3215_v58, %v4100_v8 }
 0x2e4   : > { %v2562_v40 = vmax.f32 %v2530_v16, 0.0 }
 0x2e5   : > { %v2590_v9 = vadd.f32 %v2589_v17, %v2559_v5  ;;  %v2560_v38 = vmax.f32 %v2528_v36, 0.0  ;;  %v3166_v18 = vpop.f32.mrb[12].mxu1 }
 0x2e6   : > { %v3216_v39 = vadd.f32 %v3166_v18, %v4048_v43  ;;  %v2401_v19 = vpop.f32.mrb[13].mxu1 }
 0x2e7   : > { %v2591_v21 = vadd.f32 %v2590_v9, %v2560_v38  ;;  %v3217_v22 = vadd.f32 %v2401_v19, %v4050_v44  ;;  %v3167_v23 = vpop.f32.mrb[14].mxu1 }
 0x2e8   : > { %v3218_v41 = vadd.f32 %v3167_v23, %v4052_v45  ;;  %v2404_v26 = vpop.f32.mrb[15].mxu1  ;;  %v2533_v25 = vadd.f32 %v3216_v39, %v4100_v8 }
 0x2e9   : > { %v2592_v4 = vadd.f32 %v2591_v21, %v2561_v20  ;;  %v2531_v14 = vadd.f32 %v3217_v22, %v4100_v8  ;;  %v3219_v12 = vadd.f32 %v2404_v26, %v4054_v46 }
 0x2ea   : > { %v2534_v29 = vadd.f32 %v3218_v41, %v4100_v8  ;;  %v2565_v37 = vmax.f32 %v2533_v25, 0.0 }
 0x2eb   : > { %v2563_v27 = vmax.f32 %v2531_v14, 0.0  ;;  %v2593_v28 = vadd.f32 %v2592_v4, %v2562_v40  ;;  %v2532_v43 = vadd.f32 %v3219_v12, %v4100_v8 }
 0x2ec   : > { %v2566_v49 = vmax.f32 %v2534_v29, 0.0 }
 0x2ed   : > { %v2594_v31 = vadd.f32 %v2593_v28, %v2563_v27  ;;  %v2564_v44 = vmax.f32 %v2532_v43, 0.0  ;;  %v3170_v35 = vpop.f32.mrb[16].mxu1 }
 0x2ee   : > { %v3220_v45 = vadd.f32 %v3170_v35, %v4065_v51  ;;  %v2417_v32 = vpop.f32.mrb[17].mxu1 }
 0x2ef   : > { %v2595_v42 = vadd.f32 %v2594_v31, %v2564_v44  ;;  %v3221_v30 = vadd.f32 %v2417_v32, %v4067_v52  ;;  %v3171_v48 = vpop.f32.mrb[18].mxu1 }
 0x2f0   : > { %v3222_v46 = vadd.f32 %v3171_v48, %v4069_v53  ;;  %v2420_v33 = vpop.f32.mrb[19].mxu1  ;;  %v2537_v10 = vadd.f32 %v3220_v45, %v4100_v8 }
 0x2f1   : > { %v2596_v24 = vadd.f32 %v2595_v42, %v2565_v37  ;;  %v2535_v50 = vadd.f32 %v3221_v30, %v4100_v8  ;;  %v3223_v7 = vadd.f32 %v2420_v33, %v4071_v54 }
 0x2f2   : > { %v2538_v13 = vadd.f32 %v3222_v46, %v4100_v8  ;;  %v2569_v2 = vmax.f32 %v2537_v10, 0.0 }
 0x2f3   : > { %v2567_v34 = vmax.f32 %v2535_v50, 0.0  ;;  %v2597_v55 = vadd.f32 %v2596_v24, %v2566_v49  ;;  %v2536_v51 = vadd.f32 %v3223_v7, %v4100_v8 }
 0x2f4   : > { %v2570_v16 = vmax.f32 %v2538_v13, 0.0 }
 0x2f5   : > { %v2598_v11 = vadd.f32 %v2597_v55, %v2567_v34  ;;  %v2568_v52 = vmax.f32 %v2536_v51, 0.0  ;;  %v3174_v15 = vpop.f32.mrb[20].mxu1 }
 0x2f6   : > { %v3224_v53 = vadd.f32 %v3174_v15, %v4073_v56  ;;  %v2433_v58 = vpop.f32.mrb[21].mxu1 }
 0x2f7   : > { %v2599_v5 = vadd.f32 %v2598_v11, %v2568_v52  ;;  %v3225_v17 = vadd.f32 %v2433_v58, %v4075_v57  ;;  %v3175_v36 = vpop.f32.mrb[22].mxu1 }
 0x2f8   : > { %v3226_v54 = vadd.f32 %v3175_v36, %v4077_v59  ;;  %v2436_v9 = vpop.f32.mrb[23].mxu1  ;;  %v2541_v19 = vadd.f32 %v3224_v53, %v4100_v8 }
 0x2f9   : > { %v2600_v38 = vadd.f32 %v2599_v5, %v2569_v2  ;;  %v2539_v18 = vadd.f32 %v3225_v17, %v4100_v8  ;;  %v3227_v39 = vadd.f32 %v2436_v9, %v4079_v60 }
 0x2fa   : > { %v2542_v23 = vadd.f32 %v3226_v54, %v4100_v8  ;;  %v2573_v40 = vmax.f32 %v2541_v19, 0.0 }
 0x2fb   : > { %v2571_v20 = vmax.f32 %v2539_v18, 0.0  ;;  %v2601_v21 = vadd.f32 %v2600_v38, %v2570_v16  ;;  %v2540_v56 = vadd.f32 %v3227_v39, %v4100_v8 }
 0x2fc   : > { %v2574_v27 = vmax.f32 %v2542_v23, 0.0 }
 0x2fd   : > { %v2602_v22 = vadd.f32 %v2601_v21, %v2571_v20  ;;  %v2572_v57 = vmax.f32 %v2540_v56, 0.0  ;;  %v3178_v41 = vpop.f32.mrb[24].mxu1 }
 0x2fe   : > { %v3228_v59 = vadd.f32 %v3178_v41, %v4081_v61  ;;  %v2449_v26 = vpop.f32.mrb[25].mxu1 }
 0x2ff   : > { %v2603_v4 = vadd.f32 %v2602_v22, %v2572_v57  ;;  %v3229_v14 = vadd.f32 %v2449_v26, %v4083_v62  ;;  %v3179_v12 = vpop.f32.mrb[26].mxu1 }
 0x300   : > { %v3230_v60 = vadd.f32 %v3179_v12, %v4085_v47  ;;  %v2452_v25 = vpop.f32.mrb[27].mxu1  ;;  %v2545_v29 = vadd.f32 %v3228_v59, %v4100_v8 }
 0x301   : > { %v2604_v28 = vadd.f32 %v2603_v4, %v2573_v40  ;;  %v2543_v43 = vadd.f32 %v3229_v14, %v4100_v8  ;;  %v3231_v31 = vadd.f32 %v2452_v25, %v4087_v63 }
 0x302   : > { %v2546_v32 = vadd.f32 %v3230_v60, %v4100_v8  ;;  %v2577_v30 = vmax.f32 %v2545_v29, 0.0 }
 0x303   : > { %v2575_v44 = vmax.f32 %v2543_v43, 0.0  ;;  %v2605_v35 = vadd.f32 %v2604_v28, %v2574_v27  ;;  %v2544_v61 = vadd.f32 %v3231_v31, %v4100_v8 }
 0x304   : > { %v2578_v24 = vmax.f32 %v2546_v32, 0.0 }
 0x305   : > { %v2606_v45 = vadd.f32 %v2605_v35, %v2575_v44  ;;  %v2576_v62 = vmax.f32 %v2544_v61, 0.0  ;;  %v3182_v37 = vpop.f32.mrb[28].mxu1 }
 0x306   : > { %v3232_v47 = vadd.f32 %v3182_v37, %v4089_v0  ;;  %v2465_v42 = vpop.f32.mrb[29].mxu1 }
 0x307   : > { %v2607_v48 = vadd.f32 %v2606_v45, %v2576_v62  ;;  %v3233_v46 = vadd.f32 %v2465_v42, %v4091_v1  ;;  %v3183_v33 = vpop.f32.mrb[30].mxu1 }
 0x308   : > { %v3234_v63 = vadd.f32 %v3183_v33, %v4093_v3  ;;  %v2468_v49 = vpop.f32.mrb[31].mxu1  ;;  %v2549_v34 = vadd.f32 %v3232_v47, %v4100_v8 }
 0x309   : > { %v2608_v50 = vadd.f32 %v2607_v48, %v2577_v30  ;;  %v2547_v7 = vadd.f32 %v3233_v46, %v4100_v8  ;;  %v3235_v10 = vadd.f32 %v2468_v49, %v4095_v6 }
 0x30a   : > { %v2550_v13 = vadd.f32 %v3234_v63, %v4100_v8  ;;  %v2581_v3 = vmax.f32 %v2549_v34, 0.0 }
 0x30b   : > { %v2579_v55 = vmax.f32 %v2547_v7, 0.0  ;;  %v2609_v51 = vadd.f32 %v2608_v50, %v2578_v24  ;;  %v2548_v0 = vadd.f32 %v3235_v10, %v4100_v8  ;;  %v2876_v8 = vld [vmem:[%s4179_s5] ss:$0 sm:$0xff] }
 0x30c   : > { %v2582_v15 = vmax.f32 %v2550_v13, 0.0 }
 0x30d   : > { %v2610_v11 = vadd.f32 %v2609_v51, %v2579_v55  ;;  %v2580_v1 = vmax.f32 %v2548_v0, 0.0 }
 0x30f   : > { %v2611_v52 = vadd.f32 %v2610_v11, %v2580_v1 }
 0x311   : > { %v2612_v53 = vadd.f32 %v2611_v52, %v2581_v3 }
 0x313   : > { %v2613_v58 = vadd.f32 %v2612_v53, %v2582_v15 }
 0x315   : > { %v2614_v2 = vrot.slane %v2613_v58, 4 }
 0x317   : > { %v2615_v5 = vadd.f32 %v2614_v2, %v2613_v58 }
 0x319   : > { %v2616_v6 = vrot.slane %v2615_v5, 2 }
 0x31b   : > { %v2617_v17 = vadd.f32 %v2616_v6, %v2615_v5 }
 0x31d   : > { %v2618_v36 = vrot.slane %v2617_v17, 1 }
 0x31f   : > { %v2619_v54 = vadd.f32 %v2618_v36, %v2617_v17 }
 0x321   : > { %v2620_v9 = vmul.f32 0.00390625, %v2619_v54 }
 0x323   : > { %v2621_v16 = vpack.c.bf16 %v2620_v9, %v2620_v9 }
 0x325   : > { %3201 = vmatmul.mubr.bf16.vlgmr.msra.gmra.mrb[64].mxu0 %v2621_v16 }
 0x3f8   : > { %v2727_v38 = vpop.f32.mrb[64].mxu0 }
 0x3f9   : > { %v2728_v18 = vadd.f32 %v2876_v8, %v2727_v38  ;;  %v3202_v39 = vpop.f32.mrb[65].mxu0 }
 0x3fa   : > { %v2730_v19 = vpop.f32.mrb[66].mxu0 }
 0x3fb   : > { %2733 = vst [vmem:[%s251_s29] sm:$0xff] %v2728_v18  ;;  %v3203_v20 = vpop.f32.mrb[67].mxu0 }
 0x3fc PF: > { %s16_s21 = sadd.s32 1, %s3343_s21  }
 0x3fd   : > { %p13_p5 = scmp.ge.s32.totalorder %s16_s21, 4  }
 0x3ff   :  { %15 = sbr.rel (!%p13_p5) target bundleno = 1 (0x1), region = 76 }

</bundles_post_ra>
